<compile_context>
chip_gen: v5e
topology: v5e:2x2
jax: 0.10.0
libtpu: 0.0.40
codegen_flags: <defaults>
</compile_context>

<pallas_src>
import jax
import jax.numpy as jnp
from jax.experimental import pallas as pl
from jax.experimental.pallas import tpu as pltpu

KSIZE = 4
STRIDE = 2
PAD = (KSIZE - STRIDE) // 2  # = 1
BN_EPS = 1e-5


def _make_kernel(tile_h, W, Cin):
    tile_m = tile_h * W

    def kernel(xp_ref, w_ref, shift_ref, o_ref):
        # xp_ref:    [H+2, W+2, Cin]   bf16  (full padded image, resident per n)
        # w_ref:     [9*Cin, 4*Cout]   bf16  (BN-folded, phase-packed taps)
        # shift_ref: [1, 4*Cout]       f32   (bias/BN shift, phase-packed)
        # o_ref:     [tile_m, 4*Cout]  f32
        t = pl.program_id(1)
        i0 = pl.multiple_of(t * tile_h, tile_h)
        rows = xp_ref[pl.ds(i0, tile_h + 2)]                 # [tile_h+2, W+2, Cin]

        # Fused im2col: 9 shifted (dh, dw) views, concatenated along lanes.
        cols = []
        for dh in range(3):
            for dw in range(3):
                slab = rows[dh:dh + tile_h, dw:dw + W, :]    # [tile_h, W, Cin]
                cols.append(slab.reshape(tile_m, Cin))
        p = jnp.concatenate(cols, axis=-1)                   # [tile_m, 9*Cin] bf16

        acc = jnp.dot(p, w_ref[...], preferred_element_type=jnp.float32)
        y = acc + shift_ref[...]                             # folded bias + BN
        o_ref[...] = jnp.maximum(y, 0.0).astype(o_ref.dtype)  # ReLU

    return kernel


def _pick_tile_h(H, W, target_rows=1024):
    # Largest divisor of H whose row tile (tile_h * W) is sublane aligned and
    # close to the target row count (amortizes per-grid-step overhead).
    cands = [th for th in range(1, H + 1)
             if H % th == 0 and (th * W) % 8 == 0
             and th * W <= max(target_rows, 8 * W)]
    return max(cands) if cands else H


def deconv_module(x_nchw, weight, bias, gamma, beta, running_mean, running_var):
    """x_nchw: [N, Cin, H, W] -> [N, Cout, 2H, 2W] (float32).

    weight: ConvTranspose2d weight [Cin, Cout, 4, 4]; BN uses running stats.
    """
    N, Cin, H, W = x_nchw.shape
    Cout = weight.shape[1]

    # ---- fold conv bias + BatchNorm (inference) into weight scale / shift ----
    scale = gamma / jnp.sqrt(running_var + BN_EPS)                   # [Cout]
    shift = (bias - running_mean) * scale + beta                     # [Cout]
    wf = weight.astype(jnp.float32) * scale[None, :, None, None]     # [Cin,Cout,4,4]

    # ---- phase-packed tap weights [9*Cin, 4*Cout] ----------------------------
    # Output pixel (2i+r, 2j+s) reads padded-input offsets (dh, dw) in {0,1,2}
    # with kernel taps below (sub-pixel decomposition of k=4, s=2, p=1).
    taps = {0: ((0, 3), (1, 1)),   # r (or s) = 0: (dh_pad, kh)
            1: ((1, 2), (2, 0))}   # r (or s) = 1
    wbig = jnp.zeros((9 * Cin, 4 * Cout), jnp.float32)
    for r in (0, 1):
        for s in (0, 1):
            for dh, kh in taps[r]:
                for dw, kw in taps[s]:
                    k0 = (dh * 3 + dw) * Cin
                    c0 = (r * 2 + s) * Cout
                    wbig = wbig.at[k0:k0 + Cin, c0:c0 + Cout].set(wf[:, :, kh, kw])
    wbig = wbig.astype(jnp.bfloat16)
    shift4 = jnp.tile(shift, 4).reshape(1, 4 * Cout).astype(jnp.float32)

    # ---- padded NHWC input in bf16 -------------------------------------------
    x_nhwc = jnp.transpose(x_nchw, (0, 2, 3, 1)).astype(jnp.bfloat16)
    xp = jnp.pad(x_nhwc, ((0, 0), (1, 1), (1, 1), (0, 0)))

    tile_h = _pick_tile_h(H, W)
    n_t = H // tile_h
    tile_m = tile_h * W

    out2d = pl.pallas_call(
        _make_kernel(tile_h, W, Cin),
        out_shape=jax.ShapeDtypeStruct((N * H * W, 4 * Cout), jnp.float32),
        grid_spec=pltpu.PrefetchScalarGridSpec(
            num_scalar_prefetch=0,
            grid=(N, n_t),
            in_specs=[
                # Full padded image; block index depends only on n -> one DMA
                # per batch element, reused across all row tiles.
                pl.BlockSpec((None, H + 2, W + 2, Cin),
                             lambda n, t: (n, 0, 0, 0)),
                # Weights / shift are grid-invariant (resident, no re-DMA).
                pl.BlockSpec((9 * Cin, 4 * Cout), lambda n, t: (0, 0)),
                pl.BlockSpec((1, 4 * Cout), lambda n, t: (0, 0)),
            ],
            out_specs=pl.BlockSpec((tile_m, 4 * Cout),
                                   lambda n, t: (n * n_t + t, 0)),
        ),
        compiler_params=pltpu.CompilerParams(
            # Both axes independent -> megacore / v7x 2-TC sharding.
            dimension_semantics=("parallel", "parallel")),
        # VMEM use here is < 1 MiB; for large production Cin/Cout raise
        # vmem_limit_bytes (v5e scoped default is 16 MiB, v7x physical 64 MiB).
    )(xp, wbig, shift4)

    # De-interleave the 4 sub-pixel phases and return NCHW (single XLA copy).
    out = out2d.reshape(N, H, W, 2, 2, Cout)
    out = jnp.transpose(out, (0, 5, 1, 3, 2, 4)).reshape(N, Cout, 2 * H, 2 * W)
    return out


def _reference(x, weight, bias, gamma, beta, rmean, rvar):
    # ConvTranspose2d as lhs-dilated conv with spatially-flipped kernel (f32).
    w_flip = jnp.transpose(weight, (1, 0, 2, 3))[:, :, ::-1, ::-1]  # OIHW
    conv = jax.lax.conv_general_dilated(
        x, w_flip, window_strides=(1, 1),
        padding=[(KSIZE - 1 - PAD, KSIZE - 1 - PAD)] * 2,
        lhs_dilation=(STRIDE, STRIDE), rhs_dilation=(1, 1),
        dimension_numbers=("NCHW", "OIHW", "NCHW"),
        precision=jax.lax.Precision.HIGHEST)
    conv = conv + bias[None, :, None, None]
    bn = (conv - rmean[None, :, None, None]) / jnp.sqrt(rvar[None, :, None, None] + BN_EPS)
    bn = bn * gamma[None, :, None, None] + beta[None, :, None, None]
    return jnp.maximum(bn, 0.0)


if __name__ == "__main__":
    key = jax.random.PRNGKey(0)
    k1, k2, k3, k4, k5, k6, k7 = jax.random.split(key, 7)

    N, Cin, H, W = 2, 4, 16, 16
    Cout = 8

    x = jax.random.normal(k1, (N, Cin, H, W), jnp.float32)
    # ConvTranspose2d weight shape: [in_channels, out_channels, kH, kW]
    weight = jax.random.normal(k2, (Cin, Cout, KSIZE, KSIZE), jnp.float32) * 0.1
    bias = jax.random.normal(k3, (Cout,), jnp.float32) * 0.1
    gamma = 1.0 + 0.1 * jax.random.normal(k4, (Cout,), jnp.float32)
    beta = 0.1 * jax.random.normal(k5, (Cout,), jnp.float32)
    running_mean = 0.1 * jax.random.normal(k6, (Cout,), jnp.float32)
    running_var = jax.random.uniform(k7, (Cout,), jnp.float32, minval=0.5, maxval=1.5)

    deconv = jax.jit(deconv_module)
    out = deconv(x, weight, bias, gamma, beta, running_mean, running_var)
    out = jax.block_until_ready(out)

    ref = _reference(x, weight, bias, gamma, beta, running_mean, running_var)
    assert out.shape == (N, Cout, 2 * H, 2 * W), out.shape
    # Kernel uses native bf16 MXU inputs (per perf review) against an f32
    # HIGHEST-precision reference, so tolerance is sized for bf16 rounding.
    max_err = float(jnp.max(jnp.abs(out - ref)))
    assert jnp.allclose(out, ref, atol=2e-2, rtol=2e-2), max_err

    print("KERNEL_OK")
</pallas_src>

<mosaic_0001>
module attributes {stable_mosaic.version = 11 : i64} {
  func.func @kernel(%arg0: i32, %arg1: i32, %arg2: memref<1x18x18x4xbf16, #tpu.memory_space<vmem>>, %arg3: memref<36x32xbf16, #tpu.memory_space<vmem>>, %arg4: memref<1x32xf32, #tpu.memory_space<vmem>>, %arg5: memref<256x32xf32, #tpu.memory_space<vmem>>) attributes {dimension_semantics = [#tpu.dimension_semantics<parallel>, #tpu.dimension_semantics<parallel>], iteration_bounds = array<i64: 2, 1>, scalar_prefetch = 0 : i64, scratch_operands = 0 : i64, tpu.core_type = #tpu.core_type<tc>, window_params = [{transform_indices = @transform_0, window_bounds = array<i64: 1, 18, 18, 4>}, {pipeline_mode = #tpu.pipeline_mode<synchronous>, transform_indices = @transform_1, window_bounds = array<i64: 36, 32>}, {pipeline_mode = #tpu.pipeline_mode<synchronous>, transform_indices = @transform_2, window_bounds = array<i64: 1, 32>}, {transform_indices = @transform_3, window_bounds = array<i64: 256, 32>}]} {
    %c16_i32 = arith.constant 16 : i32
    %0 = arith.muli %arg1, %c16_i32 : i32
    %1 = tpu.assume_multiple %0, 16 : i32
    %c0 = arith.constant 0 : index
    %2 = arith.index_cast %1 : i32 to index
    %c0_0 = arith.constant 0 : index
    %c0_1 = arith.constant 0 : index
    %3 = vector.load %arg2[%c0, %2, %c0_0, %c0_1] : memref<1x18x18x4xbf16, #tpu.memory_space<vmem>>, vector<1x18x18x4xbf16>
    %4 = vector.shape_cast %3 : vector<1x18x18x4xbf16> to vector<18x18x4xbf16>
    %5 = vector.extract_strided_slice %4 {offsets = [0, 0, 0], sizes = [16, 16, 4], strides = [1, 1, 1]} : vector<18x18x4xbf16> to vector<16x16x4xbf16>
    %6 = vector.shape_cast %5 : vector<16x16x4xbf16> to vector<256x4xbf16>
    %7 = vector.extract_strided_slice %4 {offsets = [0, 1, 0], sizes = [16, 16, 4], strides = [1, 1, 1]} : vector<18x18x4xbf16> to vector<16x16x4xbf16>
    %8 = vector.shape_cast %7 : vector<16x16x4xbf16> to vector<256x4xbf16>
    %9 = vector.extract_strided_slice %4 {offsets = [0, 2, 0], sizes = [16, 16, 4], strides = [1, 1, 1]} : vector<18x18x4xbf16> to vector<16x16x4xbf16>
    %10 = vector.shape_cast %9 : vector<16x16x4xbf16> to vector<256x4xbf16>
    %11 = vector.extract_strided_slice %4 {offsets = [1, 0, 0], sizes = [16, 16, 4], strides = [1, 1, 1]} : vector<18x18x4xbf16> to vector<16x16x4xbf16>
    %12 = vector.shape_cast %11 : vector<16x16x4xbf16> to vector<256x4xbf16>
    %13 = vector.extract_strided_slice %4 {offsets = [1, 1, 0], sizes = [16, 16, 4], strides = [1, 1, 1]} : vector<18x18x4xbf16> to vector<16x16x4xbf16>
    %14 = vector.shape_cast %13 : vector<16x16x4xbf16> to vector<256x4xbf16>
    %15 = vector.extract_strided_slice %4 {offsets = [1, 2, 0], sizes = [16, 16, 4], strides = [1, 1, 1]} : vector<18x18x4xbf16> to vector<16x16x4xbf16>
    %16 = vector.shape_cast %15 : vector<16x16x4xbf16> to vector<256x4xbf16>
    %17 = vector.extract_strided_slice %4 {offsets = [2, 0, 0], sizes = [16, 16, 4], strides = [1, 1, 1]} : vector<18x18x4xbf16> to vector<16x16x4xbf16>
    %18 = vector.shape_cast %17 : vector<16x16x4xbf16> to vector<256x4xbf16>
    %19 = vector.extract_strided_slice %4 {offsets = [2, 1, 0], sizes = [16, 16, 4], strides = [1, 1, 1]} : vector<18x18x4xbf16> to vector<16x16x4xbf16>
    %20 = vector.shape_cast %19 : vector<16x16x4xbf16> to vector<256x4xbf16>
    %21 = vector.extract_strided_slice %4 {offsets = [2, 2, 0], sizes = [16, 16, 4], strides = [1, 1, 1]} : vector<18x18x4xbf16> to vector<16x16x4xbf16>
    %22 = vector.shape_cast %21 : vector<16x16x4xbf16> to vector<256x4xbf16>
    %23 = tpu.concatenate %6, %8, %10, %12, %14, %16, %18, %20, %22 in 1 : vector<256x4xbf16>, vector<256x4xbf16>, vector<256x4xbf16>, vector<256x4xbf16>, vector<256x4xbf16>, vector<256x4xbf16>, vector<256x4xbf16>, vector<256x4xbf16>, vector<256x4xbf16> -> vector<256x36xbf16>
    %c0_2 = arith.constant 0 : index
    %c0_3 = arith.constant 0 : index
    %24 = vector.load %arg3[%c0_2, %c0_3] : memref<36x32xbf16, #tpu.memory_space<vmem>>, vector<36x32xbf16>
    %cst = arith.constant dense<0.000000e+00> : vector<256x32xf32>
    %25 = tpu.matmul %23, %24, %cst {dimension_numbers = #tpu.dot_dimension_numbers<[1], [0], [0], [1], [0, 0, 1, 1], [], []>} : vector<256x36xbf16>, vector<36x32xbf16>, vector<256x32xf32> -> vector<256x32xf32>
    %c0_4 = arith.constant 0 : index
    %c0_5 = arith.constant 0 : index
    %26 = vector.load %arg4[%c0_4, %c0_5] : memref<1x32xf32, #tpu.memory_space<vmem>>, vector<1x32xf32>
    %27 = vector.broadcast %26 : vector<1x32xf32> to vector<256x32xf32>
    %28 = arith.addf %25, %27 : vector<256x32xf32>
    %cst_6 = arith.constant 0.000000e+00 : f32
    %29 = vector.broadcast %cst_6 : f32 to vector<256x32xf32>
    %30 = arith.maximumf %28, %29 : vector<256x32xf32>
    %c0_7 = arith.constant 0 : index
    %c0_8 = arith.constant 0 : index
    %31 = vector.load %arg5[%c0_7, %c0_8] : memref<256x32xf32, #tpu.memory_space<vmem>>, vector<256x32xf32>
    tpu.vector_store %arg5[%c0_7, %c0_8], %30 {strides = array<i32>} : memref<256x32xf32, #tpu.memory_space<vmem>>, vector<256x32xf32>,
    return
  }
  func.func @transform_0(%arg0: i32, %arg1: i32) -> (i32, i32, i32, i32) {
    %c0_i32 = arith.constant 0 : i32
    %c0_i32_0 = arith.constant 0 : i32
    %c0_i32_1 = arith.constant 0 : i32
    %c0_i32_2 = arith.constant 0 : i32
    return %arg0, %c0_i32, %c0_i32_0, %c0_i32_1 : i32, i32, i32, i32
  }
  func.func @transform_1(%arg0: i32, %arg1: i32) -> (i32, i32) {
    %c0_i32 = arith.constant 0 : i32
    %c0_i32_0 = arith.constant 0 : i32
    %c0_i32_1 = arith.constant 0 : i32
    return %c0_i32, %c0_i32_0 : i32, i32
  }
  func.func @transform_2(%arg0: i32, %arg1: i32) -> (i32, i32) {
    %c0_i32 = arith.constant 0 : i32
    %c0_i32_0 = arith.constant 0 : i32
    %c0_i32_1 = arith.constant 0 : i32
    return %c0_i32, %c0_i32_0 : i32, i32
  }
  func.func @transform_3(%arg0: i32, %arg1: i32) -> (i32, i32) {
    %c1_i32 = arith.constant 1 : i32
    %0 = arith.muli %arg0, %c1_i32 : i32
    %1 = arith.addi %0, %arg1 : i32
    %c0_i32 = arith.constant 0 : i32
    %c0_i32_0 = arith.constant 0 : i32
    return %1, %c0_i32 : i32, i32
  }
}

</mosaic_0001>

<bundles_post_ra>
// kernel: tile.9
= control target key start
LH: loop header
LB: loop body
LE: loop exit
PB: predicated region body
PF: predicated region fallthrough
CT: control target
= control target key end

     0   :  { %s37_s8 = smov 8   ;;  %s38_s9 = smov 16   ;;  %vm7_vm0 = vcmask 64512   ;;  %vm13_vm1 = vcmask 261312   ;;  %vm19_vm2 = vcmask 195712   ;;  %vm25_vm3 = vcmask 130112   ;;  %s55_s0 = inlined_call_operand.vmem [shape: f32[4,8], index: 0, kind: input, shape index: {}]   ;;  %s56_s1 = inlined_call_operand.vmem [shape: f32[1,32], index: 1, kind: output, shape index: {}]  }
   0x1   :  { %v4_v0 = vld [vmem:[%s55_s0] sm:$0xf]  ;;  %s36_s0 = smov 24  }
   0x2   :  { %5 = vst [vmem:[#allocation1] sm:$0xf] %v4_v0 }
   0x9   :  { %v10_v1 = vld [vmem:[#allocation1 + $0x3] sm:$0x1]   ;;  %v22_v2 = vld [vmem:[#allocation1 + $0x1] sm:$0x1]   ;;  %v16_v3 = vld [vmem:[#allocation1 + $0x2] sm:$0x1]  }
   0xa   :  { %11 = vrot.lane.b32.xlu0 %v10_v1, %s36_s0  ;;  %23 = vrot.lane.b32.xlu1 %v22_v2, %s37_s8  ;;  %v6_v4 = vld [vmem:[#allocation1] sm:$0x1]  }
   0xb   :  { %8 = vst.msk [vmem:[#allocation0] sm:$0x1] %vm7_vm0, %v6_v4  }
  0x12   :  { %17 = vrot.lane.b32.xlu0 %v16_v3, %s38_s9 }
  0x7c   :  { %v12_v5 = vpop.permute.xlu0 %11   ;;  %v24_v6 = vpop.permute.xlu1 %23  }
  0x7d   :  { %14 = vst.msk [vmem:[#allocation0] sm:$0x1] %vm13_vm1, %v12_v5  }
  0x84   :  { %v18_v7 = vpop.permute.xlu0 %17  }
  0x85   :  { %20 = vst.msk [vmem:[#allocation0] sm:$0x1] %vm19_vm2, %v18_v7  }
  0x86   :  { %26 = vst.msk [vmem:[#allocation0] sm:$0x1] %vm25_vm3, %v24_v6  }
  0x8d   :  { %v29_v8 = vld [vmem:[#allocation0] sm:$0x1] }
  0x8e   :  { %32 = vst [vmem:[%s56_s1] sm:$0x1] %v29_v8 }

// kernel: tile.8
= control target key start
LH: loop header
LB: loop body
LE: loop exit
PB: predicated region body
PF: predicated region fallthrough
CT: control target
= control target key end

     0   :  { %s22_s0 = inlined_call_operand.vmem [shape: f32[8], index: 0, kind: input, shape index: {}]   ;;  %s23_s1 = inlined_call_operand.vmem [shape: f32[4,8], index: 1, kind: output, shape index: {}]  }
   0x1   :  { %v4_v0 = vld [vmem:[%s22_s0] ss:$0 sm:$0xff] }
   0x2   :  { %5 = vst [vmem:[%s23_s1] sm:$0xf] %v4_v0 }

// kernel: deconv_module.1
= control target key start
LH: loop header
LB: loop body
LE: loop exit
PB: predicated region body
PF: predicated region fallthrough
CT: control target
= control target key end

     0   :  { %s2087_s12 = smov 0   ;;  %s2089_s13 = smov 0   ;;  %s3322_s0 = inlined_call_operand.vmem [shape: bf16[2,18,18,4], index: 0, kind: input, shape index: {}]   ;;  %s3323_s1 = inlined_call_operand.vmem [shape: bf16[36,32], index: 1, kind: input, shape index: {}]   ;;  %s3324_s2 = inlined_call_operand.vmem [shape: f32[1,32], index: 2, kind: input, shape index: {}]   ;;  %s3325_s3 = inlined_call_operand.vmem [shape: f32[512,32], index: 3, kind: output, shape index: {}]  }
   0x1   :  { %s2091_s14 = smov 0  }
   0x2 LB: > { %s25_s15 = sadd.s32 1, %s2053_s13  ;;  %p1852_p0 = scmp.ge.s32.totalorder %s2057_s14, 1  ;;  %s2057_s14 = sphi %s2091_s14, %s13_s14   ;;  %s2053_s13 = sphi %s2089_s13, %s3386_s13   ;;  %s2049_s12 = sphi %s2087_s12, %s3385_s12  }
   0x3   : > { %p27_p1 = scmp.ge.s32.totalorder %s25_s15, 2  ;;  %p151_p2 = scmp.lt.s32.totalorder %s2057_s14, 3 }
   0x5   : > { %s3388_s15 = smov (%p27_p1, %s25_s15), 0  ;;  %p152_p3 = pnand %p1852_p0, %p151_p2 }
   0x7   : > { %155 = sbr.rel (%p152_p3) target bundleno = 660 (0x294), region = 32 }
   0xc   : > { %p176_p4 = scmp.lt.s32.totalorder %s2049_s12, 1  ;;  %vm248_vm0 = vsmask.f32 3328  ;;  %vm249_vm1 = vsmask.f32 7440  ;;  %s2059_s21 = smov 4  }
   0xd   : > { %vm2150_vm2 = vmor %vm248_vm0, %vm249_vm1  ;;  %vm683_vm3 = vcmask 1042432   ;;  %vm684_vm4 = vcmask 1046532   ;;  %s2060_s22 = smov 8   ;;  %s2061_s23 = smov 12   ;;  %vm1284_vm6 = vcmask 31744   ;;  %vm1333_vm7 = vcmask 64512  }
   0xe   : > { %s177_s16 = scalar_select %p176_p4, %s2049_s12, 1  ;;  %vm2437_vm5 = vmor %vm683_vm3, %vm684_vm4  ;;  %vm1366_vm8 = vcmask 97280   ;;  %vm1621_vm9 = vcmask 1041408   ;;  %vm1399_vm10 = vcmask 130048   ;;  %vm1432_vm11 = vcmask 162816  }
   0xf   : > { %s2062_s24 = smov 16   ;;  %s2063_s25 = smov 20   ;;  %vm1465_vm12 = vcmask 195584   ;;  %vm1498_vm13 = vcmask 228352   ;;  %vm1531_vm14 = vcmask 261120   ;;  %vm1588_vm15 = vcmask 293888  }
  0x10   : > { %s2001_s17 = smul.u32 216, %s177_s16  ;;  %s2064_s26 = smov 28  }
  0x11   : > { %s2065_s27 = smov 24   ;;  %s2066_s28 = smov 32  }
  0x12   : > { %s2112_s20 = scalar_lea.vmem %s3322_s0, %s2001_s17  ;;  %s1854_s8 = sshll.u32 %s2049_s12, 5 }
  0x13   : > { %v2115_v0 = vld [vmem:[%s2112_s20 + $0x30] sm:$0xf]  ;;  %v2118_v1 = vld [vmem:[%s2112_s20 + $0x34] sm:$0xf]  ;;  %v2121_v2 = vld [vmem:[%s2112_s20 + $0x38] sm:$0x1] }
  0x14   : > { %v348_v3 = vshrl.u32 %v2115_v0, 16  ;;  %v351_v4 = vshll.u32 %v2115_v0, 16  ;;  %v357_v5 = vshll.u32 %v2118_v1, 16  ;;  %v361_v6 = vshrl.u32 %v2118_v1, 16  ;;  %v2128_v7 = vld [vmem:[%s2112_s20 + $0x18] sm:$0xf] }
  0x15   : > { %v367_v8 = vshll.u32 %v2121_v2, 16  ;;  %v2132_v9 = vld [vmem:[%s2112_s20 + $0x1c] sm:$0xf]  ;;  %v2135_v10 = vld [vmem:[%s2112_s20 + $0x20] sm:$0x1]  ;;  %v300_v11 = vshrl.u32 %v2128_v7, 16 }
  0x16   : > { %v350_v12 = vrot.slane %v348_v3, 4  ;;  %v353_v13 = vrot.slane %v351_v4, 5  ;;  %v359_v14 = vrot.slane %v357_v5, 5  ;;  %v363_v15 = vrot.slane %v361_v6, 4  ;;  %v2139_v16 = vld [vmem:[%s2112_s20] sm:$0xf] }
  0x17   : > { %v369_v17 = vrot.slane %v367_v8, 5  ;;  %v302_v18 = vrot.slane %v300_v11, 4  ;;  %v303_v19 = vshll.u32 %v2128_v7, 16  ;;  %v309_v20 = vshll.u32 %v2132_v9, 16  ;;  %v2146_v25 = vld [vmem:[%s2112_s20 + $0x4] sm:$0xf] }
  0x18   : > { %v354_v21 = vor.u32 %v353_v13, %v350_v12  ;;  %v364_v22 = vor.u32 %v363_v15, %v359_v14  ;;  %v313_v23 = vshrl.u32 %v2132_v9, 16  ;;  %v319_v24 = vshll.u32 %v2135_v10, 16  ;;  %v2157_v36 = vld [vmem:[%s2112_s20 + $0x8] sm:$0x1]  ;;  %v2166_v44 = vld [vmem:[%s2112_s20 + $0x3c] sm:$0xf] }
  0x19   : > { %v305_v27 = vrot.slane %v303_v19, 5  ;;  %v311_v28 = vrot.slane %v309_v20, 5  ;;  %v252_v29 = vshrl.u32 %v2139_v16, 16  ;;  %v255_v30 = vshll.u32 %v2139_v16, 16  ;;  %v2174_v56 = vld [vmem:[%s2112_s20 + $0x40] sm:$0xf] }
  0x1a   : > { %v355_v31 = vrot.slane %v354_v21, 4  ;;  %v365_v32 = vrot.slane %v364_v22, 4  ;;  %v315_v33 = vrot.slane %v313_v23, 4  ;;  %v321_v34 = vrot.slane %v319_v24, 5  ;;  %v2180_v62 = vld [vmem:[%s2112_s20 + $0x44] sm:$0x1] }
  0x1b   : > { %v306_v35 = vor.u32 %v305_v27, %v302_v18  ;;  %v254_v37 = vrot.slane %v252_v29, 4  ;;  %v257_v38 = vrot.slane %v255_v30, 5  ;;  %v261_v39 = vshll.u32 %v2146_v25, 16  ;;  %v2183_v63 = vld [vmem:[%s2112_s20 + $0x24] sm:$0xf]  ;;  %p183_p5 = scmp.lt.s32.totalorder %s1854_s8, 63 }
  0x1c   : > { %v360_v40 = vsel %vm2150_vm2, %v355_v31, %v359_v14  ;;  %v370_v41 = vsel %vm2150_vm2, %v365_v32, %v369_v17  ;;  %v316_v42 = vor.u32 %v315_v33, %v311_v28  ;;  %v265_v43 = vshrl.u32 %v2146_v25, 16  ;;  %v2193_v14 = vld [vmem:[%s2112_s20 + $0x28] sm:$0xf]  ;;  %v2199_v19 = vld [vmem:[%s2112_s20 + $0x2c] sm:$0x1] }
  0x1d   : > { %v922_v45 = vunpack.c.l.b16 %v360_v40  ;;  %v923_v46 = vunpack.c.l.b16 %v370_v41  ;;  %v307_v47 = vrot.slane %v306_v35, 4  ;;  %v258_v48 = vor.u32 %v257_v38, %v254_v37  ;;  %v2206_v27 = vld [vmem:[%s2112_s20 + $0xc] sm:$0xf]  ;;  %v2214_v40 = vld [vmem:[%s2112_s20 + $0x10] sm:$0xf]  ;;  %s3390_s8 = smov (!%p183_p5, %s1854_s8), 63 }
  0x1e   : > { %v317_v49 = vrot.slane %v316_v42, 4  ;;  %v263_v50 = vrot.slane %v261_v39, 5  ;;  %v267_v51 = vrot.slane %v265_v43, 4  ;;  %v271_v52 = vshll.u32 %v2157_v36, 16  ;;  %s1855_s11 = sshll.u32 %s3390_s8, 3 }
  0x1f   : > { %v2169_v53 = vpack.c.b16 %v923_v46, %v922_v45  ;;  %v312_v54 = vsel %vm2150_vm2, %v307_v47, %v311_v28  ;;  %v259_v55 = vrot.slane %v258_v48, 4  ;;  %v372_v57 = vshrl.u32 %v2166_v44, 16  ;;  %v2218_v47 = vld [vmem:[%s2112_s20 + $0x14] sm:$0x1]  ;;  %s3186_s17 = scalar_lea.vmem %s3325_s3, %s1855_s11 }
  0x20   : > { %v322_v58 = vsel %vm2150_vm2, %v317_v49, %v321_v34  ;;  %v918_v59 = vunpack.c.l.b16 %v312_v54  ;;  %v268_v60 = vor.u32 %v267_v51, %v263_v50  ;;  %v273_v61 = vrot.slane %v271_v52, 5  ;;  %v2225_v52 = vld [vmem:[%s2112_s20 + $0x60] sm:$0xf] }
  0x21   : > { %3353 = vst [vmem:[#allocation2_spill] sm:$0xff] %v2169_v53  ;;  %970 = vrot.lane.b32.xlu2 %v2169_v53, %s2059_s21  ;;  %v919_v3 = vunpack.c.l.b16 %v322_v58  ;;  %v264_v4 = vsel %vm2150_vm2, %v259_v55, %v263_v50  ;;  %v374_v5 = vrot.slane %v372_v57, 4  ;;  %v375_v6 = vshll.u32 %v2166_v44, 16  ;;  %v2351_v53 = vld [vmem:[%s2112_s20 + $0x74] sm:$0x1] }
  0x22   : > { %v269_v8 = vrot.slane %v268_v60, 4  ;;  %v914_v11 = vunpack.c.l.b16 %v264_v4  ;;  %v381_v12 = vshll.u32 %v2174_v56, 16  ;;  %v385_v13 = vshrl.u32 %v2174_v56, 16 }
  0x23   : > { %v2195_v15 = vpack.c.b16 %v919_v3, %v918_v59  ;;  %v377_v17 = vrot.slane %v375_v6, 5  ;;  %v391_v18 = vshll.u32 %v2180_v62, 16  ;;  %v324_v20 = vshrl.u32 %v2183_v63, 16 }
  0x24   : > { %v274_v21 = vsel %vm2150_vm2, %v269_v8, %v273_v61  ;;  %v383_v22 = vrot.slane %v381_v12, 5  ;;  %v387_v23 = vrot.slane %v385_v13, 4  ;;  %v327_v24 = vshll.u32 %v2183_v63, 16  ;;  %v2235_v8 = vld [vmem:[%s2112_s20 + $0x64] sm:$0xf] }
  0x25   : > { %3354 = vst [vmem:[#allocation3_spill] sm:$0xff] %v2195_v15  ;;  %966 = vrot.lane.b32.xlu1 %v2195_v15, %s2059_s21  ;;  %v915_v28 = vunpack.c.l.b16 %v274_v21  ;;  %v378_v29 = vor.u32 %v377_v17, %v374_v5  ;;  %v393_v30 = vrot.slane %v391_v18, 5  ;;  %v326_v31 = vrot.slane %v324_v20, 4  ;;  %v2241_v20 = vld [vmem:[%s2112_s20 + $0x68] sm:$0x1] }
  0x26   : > { %v388_v32 = vor.u32 %v387_v23, %v383_v22  ;;  %v329_v33 = vrot.slane %v327_v24, 5  ;;  %v333_v34 = vshll.u32 %v2193_v14, 16  ;;  %v337_v35 = vshrl.u32 %v2193_v14, 16  ;;  %v2244_v21 = vld [vmem:[%s2112_s20 + $0x54] sm:$0xf] }
  0x27   : > { %v946_v37 = vpack.c.b16 %v915_v28, %v914_v11  ;;  %v379_v38 = vrot.slane %v378_v29, 4  ;;  %v343_v39 = vshll.u32 %v2199_v19, 16  ;;  %v276_v41 = vshrl.u32 %v2206_v27, 16  ;;  %v2397_v15 = vld [vmem:[%s2112_s20 + $0xa4] sm:$0x1] }
  0x28   : > { %v389_v42 = vrot.slane %v388_v32, 4  ;;  %v330_v43 = vor.u32 %v329_v33, %v326_v31  ;;  %v335_v45 = vrot.slane %v333_v34, 5  ;;  %v339_v46 = vrot.slane %v337_v35, 4 }
  0x29   : > { %962 = vrot.lane.b32.xlu0 %v946_v37, %s2059_s21  ;;  %v384_v48 = vsel %vm2150_vm2, %v379_v38, %v383_v22  ;;  %v345_v49 = vrot.slane %v343_v39, 5  ;;  %v278_v50 = vrot.slane %v276_v41, 4  ;;  %v279_v51 = vshll.u32 %v2206_v27, 16  ;;  %v2255_v37 = vld [vmem:[%s2112_s20 + $0x58] sm:$0xf] }
  0x2a   : > { %v394_v54 = vsel %vm2150_vm2, %v389_v42, %v393_v30  ;;  %v924_v55 = vunpack.c.l.b16 %v384_v48  ;;  %v331_v57 = vrot.slane %v330_v43, 4  ;;  %v340_v58 = vor.u32 %v339_v46, %v335_v45 }
  0x2b   : > { %v925_v59 = vunpack.c.l.b16 %v394_v54  ;;  %v281_v60 = vrot.slane %v279_v51, 5  ;;  %v285_v61 = vshll.u32 %v2214_v40, 16  ;;  %v289_v3 = vshrl.u32 %v2214_v40, 16 }
  0x2c   : > { %v336_v4 = vsel %vm2150_vm2, %v331_v57, %v335_v45  ;;  %v341_v5 = vrot.slane %v340_v58, 4  ;;  %v295_v6 = vshll.u32 %v2218_v47, 16  ;;  %v444_v11 = vshrl.u32 %v2225_v52, 16  ;;  %v2263_v45 = vld [vmem:[%s2112_s20 + $0x5c] sm:$0x1] }
  0x2d   : > { %v2238_v12 = vpack.c.b16 %v925_v59, %v924_v55  ;;  %v920_v13 = vunpack.c.l.b16 %v336_v4  ;;  %v282_v17 = vor.u32 %v281_v60, %v278_v50  ;;  %v287_v18 = vrot.slane %v285_v61, 5  ;;  %v2270_v58 = vld [vmem:[%s2112_s20 + $0x48] sm:$0xf] }
  0x2e   : > { %v346_v22 = vsel %vm2150_vm2, %v341_v5, %v345_v49  ;;  %v291_v23 = vrot.slane %v289_v3, 4  ;;  %v297_v24 = vrot.slane %v295_v6, 5  ;;  %v446_v28 = vrot.slane %v444_v11, 4 }
  0x2f   : > { %3355 = vst [vmem:[#allocation4_spill] sm:$0xff] %v2238_v12  ;;  %972 = vrot.lane.b32.xlu2 %v2238_v12, %s2059_s21  ;;  %v921_v29 = vunpack.c.l.b16 %v346_v22  ;;  %v283_v30 = vrot.slane %v282_v17, 4  ;;  %v447_v31 = vshll.u32 %v2225_v52, 16  ;;  %v453_v32 = vshll.u32 %v2235_v8, 16  ;;  %v2277_v22 = vld [vmem:[%s2112_s20 + $0x4c] sm:$0xf] }
  0x30   : > { %v292_v33 = vor.u32 %v291_v23, %v287_v18  ;;  %v457_v34 = vshrl.u32 %v2235_v8, 16  ;;  %v463_v35 = vshll.u32 %v2241_v20, 16  ;;  %v420_v38 = vshrl.u32 %v2244_v21, 16  ;;  %v2389_v12 = vld [vmem:[%s2112_s20 + $0xa0] sm:$0xf] }
  0x31   : > { %v2258_v39 = vpack.c.b16 %v921_v29, %v920_v13  ;;  %v288_v41 = vsel %vm2150_vm2, %v283_v30, %v287_v18  ;;  %v449_v42 = vrot.slane %v447_v31, 5  ;;  %v455_v43 = vrot.slane %v453_v32, 5  ;;  %v2285_v30 = vld [vmem:[%s2112_s20 + $0x50] sm:$0x1]  ;;  %v2289_v32 = vld [vmem:[%s2112_s20 + $0x84] sm:$0xf] }
  0x32   : > { %v293_v46 = vrot.slane %v292_v33, 4  ;;  %v916_v48 = vunpack.c.l.b16 %v288_v41  ;;  %v459_v49 = vrot.slane %v457_v34, 4  ;;  %v465_v50 = vrot.slane %v463_v35, 5 }
  0x33   : > { %3356 = vst [vmem:[#allocation5_spill] sm:$0xff] %v2258_v39  ;;  %968 = vrot.lane.b32.xlu1 %v2258_v39, %s2059_s21  ;;  %v450_v51 = vor.u32 %v449_v42, %v446_v28  ;;  %v422_v54 = vrot.slane %v420_v38, 4  ;;  %v423_v55 = vshll.u32 %v2244_v21, 16  ;;  %v429_v57 = vshll.u32 %v2255_v37, 16 }
  0x34   : > { %v298_v59 = vsel %vm2150_vm2, %v293_v46, %v297_v24  ;;  %v460_v60 = vor.u32 %v459_v49, %v455_v43  ;;  %v433_v61 = vshrl.u32 %v2255_v37, 16  ;;  %v439_v3 = vshll.u32 %v2263_v45, 16 }
  0x35   : > { %v917_v4 = vunpack.c.l.b16 %v298_v59  ;;  %v451_v5 = vrot.slane %v450_v51, 4  ;;  %v425_v6 = vrot.slane %v423_v55, 5  ;;  %v431_v11 = vrot.slane %v429_v57, 5 }
  0x36   : > { %v461_v13 = vrot.slane %v460_v60, 4  ;;  %v435_v17 = vrot.slane %v433_v61, 4  ;;  %v441_v18 = vrot.slane %v439_v3, 5  ;;  %v396_v23 = vshrl.u32 %v2270_v58, 16  ;;  %v2304_v60 = vld [vmem:[%s2112_s20 + $0x88] sm:$0xf] }
  0x37   : > { %v2280_v28 = vpack.c.b16 %v917_v4, %v916_v48  ;;  %v456_v24 = vsel %vm2150_vm2, %v451_v5, %v455_v43  ;;  %v426_v29 = vor.u32 %v425_v6, %v422_v54  ;;  %v399_v31 = vshll.u32 %v2270_v58, 16  ;;  %v2307_v61 = vld [vmem:[%s2112_s20 + $0x8c] sm:$0x1] }
  0x38   : > { %v466_v33 = vsel %vm2150_vm2, %v461_v13, %v465_v50  ;;  %v930_v34 = vunpack.c.l.b16 %v456_v24  ;;  %v436_v35 = vor.u32 %v435_v17, %v431_v11  ;;  %v398_v38 = vrot.slane %v396_v23, 4  ;;  %3359 = vst [vmem:[#allocation8_spill] sm:$0xff] %v2307_v61  ;;  %v2312_v13 = vld [vmem:[%s2112_s20 + $0x78] sm:$0xf] }
  0x39   : > { %3357 = vst [vmem:[#allocation6_spill] sm:$0xff] %v2280_v28  ;;  %964 = vrot.lane.b32.xlu0 %v2280_v28, %s2059_s21  ;;  %v931_v41 = vunpack.c.l.b16 %v466_v33  ;;  %v427_v42 = vrot.slane %v426_v29, 4  ;;  %v401_v43 = vrot.slane %v399_v31, 5  ;;  %v405_v46 = vshll.u32 %v2277_v22, 16 }
  0x3a   : > { %v437_v48 = vrot.slane %v436_v35, 4  ;;  %v409_v49 = vshrl.u32 %v2277_v22, 16  ;;  %v415_v51 = vshll.u32 %v2285_v30, 16  ;;  %v516_v50 = vshrl.u32 %v2289_v32, 16 }
  0x3b   : > { %v2299_v54 = vpack.c.b16 %v931_v41, %v930_v34  ;;  %v432_v55 = vsel %vm2150_vm2, %v427_v42, %v431_v11  ;;  %v402_v57 = vor.u32 %v401_v43, %v398_v38  ;;  %v407_v59 = vrot.slane %v405_v46, 5  ;;  %v2325_v41 = vld [vmem:[%s2112_s20 + $0x7c] sm:$0xf] }
  0x3c   : > { %v442_v3 = vsel %vm2150_vm2, %v437_v48, %v441_v18  ;;  %v928_v4 = vunpack.c.l.b16 %v432_v55  ;;  %v411_v5 = vrot.slane %v409_v49, 4  ;;  %v417_v6 = vrot.slane %v415_v51, 5  ;;  %v2329_v51 = vld [vmem:[%s2112_s20 + $0x80] sm:$0x1] }
  0x3d   : > { %3358 = vst [vmem:[#allocation7_spill] sm:$0xff] %v2299_v54  ;;  %978 = vrot.lane.b32.xlu2 %v2299_v54, %s2059_s21  ;;  %v929_v17 = vunpack.c.l.b16 %v442_v3  ;;  %v403_v11 = vrot.slane %v402_v57, 4  ;;  %v518_v23 = vrot.slane %v516_v50, 4  ;;  %v519_v24 = vshll.u32 %v2289_v32, 16  ;;  %v2335_v3 = vld [vmem:[%s2112_s20 + $0x6c] sm:$0xf] }
  0x3e   : > { %v412_v29 = vor.u32 %v411_v5, %v407_v59  ;;  %v525_v31 = vshll.u32 %v2304_v60, 16  ;;  %v529_v18 = vshrl.u32 %v2304_v60, 16  ;;  %v535_v33 = vshll.u32 %v2307_v61, 16 }
  0x3f   : > { %v2320_v34 = vpack.c.b16 %v929_v17, %v928_v4  ;;  %v408_v35 = vsel %vm2150_vm2, %v403_v11, %v407_v59  ;;  %v521_v38 = vrot.slane %v519_v24, 5  ;;  %v492_v42 = vshrl.u32 %v2312_v13, 16 }
  0x40   : > { %v413_v43 = vrot.slane %v412_v29, 4  ;;  %v926_v46 = vunpack.c.l.b16 %v408_v35  ;;  %v527_v48 = vrot.slane %v525_v31, 5  ;;  %v531_v49 = vrot.slane %v529_v18, 4 }
  0x41   : > { %3360 = vst [vmem:[#allocation9_spill] sm:$0xff] %v2320_v34  ;;  %976 = vrot.lane.b32.xlu1 %v2320_v34, %s2059_s21  ;;  %v522_v50 = vor.u32 %v521_v38, %v518_v23  ;;  %v537_v55 = vrot.slane %v535_v33, 5  ;;  %v494_v57 = vrot.slane %v492_v42, 4  ;;  %v495_v59 = vshll.u32 %v2312_v13, 16  ;;  %v2343_v38 = vld [vmem:[%s2112_s20 + $0x70] sm:$0xf] }
  0x42   : > { %v418_v4 = vsel %vm2150_vm2, %v413_v43, %v417_v6  ;;  %v532_v5 = vor.u32 %v531_v49, %v527_v48  ;;  %v501_v17 = vshll.u32 %v2325_v41, 16  ;;  %v505_v11 = vshrl.u32 %v2325_v41, 16 }
  0x43   : > { %v927_v24 = vunpack.c.l.b16 %v418_v4  ;;  %v523_v29 = vrot.slane %v522_v50, 4  ;;  %v497_v23 = vrot.slane %v495_v59, 5  ;;  %v511_v31 = vshll.u32 %v2329_v51, 16  ;;  %v2354_v50 = vld [vmem:[%s2112_s20 + $0xa8] sm:$0xf] }
  0x44   : > { %v533_v18 = vrot.slane %v532_v5, 4  ;;  %v503_v33 = vrot.slane %v501_v17, 5  ;;  %v507_v35 = vrot.slane %v505_v11, 4  ;;  %v468_v42 = vshrl.u32 %v2335_v3, 16  ;;  %3362 = vst [vmem:[#allocation11_spill] sm:$0xff] %v2354_v50 }
  0x45   : > { %v2346_v6 = vpack.c.b16 %v927_v24, %v926_v46  ;;  %v528_v43 = vsel %vm2150_vm2, %v523_v29, %v527_v48  ;;  %v498_v49 = vor.u32 %v497_v23, %v494_v57  ;;  %v513_v54 = vrot.slane %v511_v31, 5 }
  0x46   : > { %v538_v59 = vsel %vm2150_vm2, %v533_v18, %v537_v55  ;;  %v936_v4 = vunpack.c.l.b16 %v528_v43  ;;  %v508_v5 = vor.u32 %v507_v35, %v503_v33  ;;  %v470_v17 = vrot.slane %v468_v42, 4  ;;  %v2370_v43 = vld [vmem:[%s2112_s20 + $0xac] sm:$0xf] }
  0x47   : > { %3361 = vst [vmem:[#allocation10_spill] sm:$0xff] %v2346_v6  ;;  %974 = vrot.lane.b32.xlu0 %v2346_v6, %s2059_s21  ;;  %v937_v46 = vunpack.c.l.b16 %v538_v59  ;;  %v499_v11 = vrot.slane %v498_v49, 4  ;;  %v471_v48 = vshll.u32 %v2335_v3, 16  ;;  %v477_v57 = vshll.u32 %v2343_v38, 16  ;;  %v2373_v49 = vld [vmem:[%s2112_s20 + $0xb0] sm:$0x1] }
  0x48   : > { %v509_v24 = vrot.slane %v508_v5, 4  ;;  %v481_v29 = vshrl.u32 %v2343_v38, 16  ;;  %v487_v55 = vshll.u32 %v2351_v53, 16  ;;  %v588_v23 = vshrl.u32 %v2354_v50, 16  ;;  %3364 = vst [vmem:[#allocation13_spill] sm:$0xff] %v2370_v43 }
  0x49   : > { %v2365_v31 = vpack.c.b16 %v937_v46, %v936_v4  ;;  %v504_v18 = vsel %vm2150_vm2, %v499_v11, %v503_v33  ;;  %v473_v35 = vrot.slane %v471_v48, 5  ;;  %v479_v42 = vrot.slane %v477_v57, 5  ;;  %3365 = vst [vmem:[#allocation14_spill] sm:$0xff] %v2373_v49  ;;  %v2378_v6 = vld [vmem:[%s2112_s20 + $0x9c] sm:$0xf] }
  0x4a   : > { %v514_v59 = vsel %vm2150_vm2, %v509_v24, %v513_v54  ;;  %v934_v5 = vunpack.c.l.b16 %v504_v18  ;;  %v483_v39 = vrot.slane %v481_v29, 4  ;;  %v489_v34 = vrot.slane %v487_v55, 5 }
  0x4b   : > { %3363 = vst [vmem:[#allocation12_spill] sm:$0xff] %v2365_v31  ;;  %984 = vrot.lane.b32.xlu2 %v2365_v31, %s2059_s21  ;;  %v935_v4 = vunpack.c.l.b16 %v514_v59  ;;  %v474_v33 = vor.u32 %v473_v35, %v470_v17  ;;  %v590_v46 = vrot.slane %v588_v23, 4  ;;  %v591_v11 = vshll.u32 %v2354_v50, 16 }
  0x4c   : > { %v484_v48 = vor.u32 %v483_v39, %v479_v42  ;;  %v597_v57 = vshll.u32 %v2370_v43, 16  ;;  %v601_v54 = vshrl.u32 %v2370_v43, 16  ;;  %v607_v24 = vshll.u32 %v2373_v49, 16 }
  0x4d   : > { %v2386_v29 = vpack.c.b16 %v935_v4, %v934_v5  ;;  %v475_v55 = vrot.slane %v474_v33, 4  ;;  %v593_v18 = vrot.slane %v591_v11, 5  ;;  %v564_v17 = vshrl.u32 %v2378_v6, 16  ;;  %v2401_v33 = vld [vmem:[%s2112_s20 + $0x90] sm:$0xf] }
  0x4e   : > { %v485_v23 = vrot.slane %v484_v48, 4  ;;  %v599_v35 = vrot.slane %v597_v57, 5  ;;  %v603_v59 = vrot.slane %v601_v54, 4  ;;  %v609_v39 = vrot.slane %v607_v24, 5 }
  0x4f   : > { %3366 = vst [vmem:[#allocation15_spill] sm:$0xff] %v2386_v29  ;;  %982 = vrot.lane.b32.xlu1 %v2386_v29, %s2059_s21  ;;  %v480_v31 = vsel %vm2150_vm2, %v475_v55, %v479_v42  ;;  %v594_v28 = vor.u32 %v593_v18, %v590_v46  ;;  %v566_v5 = vrot.slane %v564_v17, 4  ;;  %v567_v4 = vshll.u32 %v2378_v6, 16 }
  0x50   : > { %v490_v11 = vsel %vm2150_vm2, %v485_v23, %v489_v34  ;;  %v932_v48 = vunpack.c.l.b16 %v480_v31  ;;  %v604_v57 = vor.u32 %v603_v59, %v599_v35  ;;  %v573_v54 = vshll.u32 %v2389_v12, 16  ;;  %v2414_v59 = vld [vmem:[%s2112_s20 + $0x94] sm:$0xf] }
  0x51   : > { %v933_v24 = vunpack.c.l.b16 %v490_v11  ;;  %v595_v29 = vrot.slane %v594_v28, 4  ;;  %v569_v42 = vrot.slane %v567_v4, 5  ;;  %v577_v46 = vshrl.u32 %v2389_v12, 16  ;;  %v2417_v11 = vld [vmem:[%s2112_s20 + $0x98] sm:$0x1] }
  0x52   : > { %v605_v55 = vrot.slane %v604_v57, 4  ;;  %v575_v18 = vrot.slane %v573_v54, 5  ;;  %v583_v17 = vshll.u32 %v2397_v15, 16  ;;  %v540_v49 = vshrl.u32 %v2401_v33, 16 }
  0x53   : > { %v2409_v43 = vpack.c.b16 %v933_v24, %v932_v48  ;;  %v600_v34 = vsel %vm2150_vm2, %v595_v29, %v599_v35  ;;  %v570_v31 = vor.u32 %v569_v42, %v566_v5  ;;  %v579_v23 = vrot.slane %v577_v46, 4 }
  0x54   : > { %v610_v28 = vsel %vm2150_vm2, %v605_v55, %v609_v39  ;;  %v942_v4 = vunpack.c.l.b16 %v600_v34  ;;  %v585_v57 = vrot.slane %v583_v17, 5  ;;  %v542_v54 = vrot.slane %v540_v49, 4 }
  0x55   : > { %3367 = vst [vmem:[#allocation16_spill] sm:$0xff] %v2409_v43  ;;  %980 = vrot.lane.b32.xlu0 %v2409_v43, %s2059_s21  ;;  %v943_v48 = vunpack.c.l.b16 %v610_v28  ;;  %v571_v24 = vrot.slane %v570_v31, 4  ;;  %v580_v50 = vor.u32 %v579_v23, %v575_v18  ;;  %v543_v29 = vshll.u32 %v2401_v33, 16 }
  0x56   : > { %v549_v35 = vshll.u32 %v2414_v59, 16  ;;  %v553_v5 = vshrl.u32 %v2414_v59, 16  ;;  %v559_v42 = vshll.u32 %v2417_v11, 16 }
  0x57   : > { %v2427_v46 = vpack.c.b16 %v943_v48, %v942_v4  ;;  %v576_v49 = vsel %vm2150_vm2, %v571_v24, %v575_v18  ;;  %v581_v39 = vrot.slane %v580_v50, 4  ;;  %v545_v55 = vrot.slane %v543_v29, 5 }
  0x58   : > { %v940_v17 = vunpack.c.l.b16 %v576_v49  ;;  %v551_v34 = vrot.slane %v549_v35, 5  ;;  %v555_v31 = vrot.slane %v553_v5, 4  ;;  %v561_v23 = vrot.slane %v559_v42, 5 }
  0x59   : > { %990 = vrot.lane.b32.xlu2 %v2427_v46, %s2059_s21  ;;  %v586_v28 = vsel %vm2150_vm2, %v581_v39, %v585_v57  ;;  %v546_v43 = vor.u32 %v545_v55, %v542_v54  ;;  %v1857_v4 = vrot.slane %v2206_v27, 9  ;;  %v695_v18 = vrot.slane %v2214_v40, 5  ;;  %v2451_v39 = vld [vmem:[%s2112_s20 + $0xb4] sm:$0xf] }
  0x5a   : > { %v941_v48 = vunpack.c.l.b16 %v586_v28  ;;  %v556_v61 = vor.u32 %v555_v31, %v551_v34  ;;  %v698_v24 = vrot.slane %v2218_v47, 5  ;;  %v1856_v57 = vrot.slane %v2139_v16, 9  ;;  %v2467_v31 = vld [vmem:[%s2112_s20 + $0xbc] sm:$0x1] }
  0x5b   : > { %v547_v29 = vrot.slane %v546_v43, 4  ;;  %v688_v54 = vrot.slane %v2146_v25, 5  ;;  %v691_v35 = vrot.slane %v2157_v36, 5  ;;  %v696_v42 = vsel %vm2437_vm5, %v1857_v4, %v695_v18  ;;  %v2458_v43 = vld [vmem:[%s2112_s20 + $0xb8] sm:$0xf] }
  0x5c   : > { %v2446_v27 = vpack.c.b16 %v941_v48, %v940_v17  ;;  %v557_v5 = vrot.slane %v556_v61, 4  ;;  %v697_v49 = vrot.slane %v695_v18, 4  ;;  %v996_v47 = vunpack.c.l.b16 %v696_v42 }
  0x5d   : > { %v552_v40 = vsel %vm2150_vm2, %v547_v29, %v551_v34  ;;  %v689_v16 = vsel %vm2437_vm5, %v1856_v57, %v688_v54  ;;  %v690_v25 = vrot.slane %v688_v54, 4  ;;  %v612_v48 = vshrl.u32 %v2451_v39, 16 }
  0x5e   : > { %988 = vrot.lane.b32.xlu1 %v2446_v27, %s2059_s21  ;;  %v562_v36 = vsel %vm2150_vm2, %v557_v5, %v561_v23  ;;  %v938_v61 = vunpack.c.l.b16 %v552_v40  ;;  %v699_v55 = vsel %vm2437_vm5, %v697_v49, %v698_v24  ;;  %v994_v17 = vunpack.c.l.b16 %v689_v16 }
  0x5f   : > { %v939_v34 = vunpack.c.l.b16 %v562_v36  ;;  %v997_v28 = vunpack.c.l.b16 %v699_v55  ;;  %v692_v4 = vsel %vm2437_vm5, %v690_v25, %v691_v35  ;;  %v615_v29 = vshll.u32 %v2451_v39, 16 }
  0x60   : > { %v995_v18 = vunpack.c.l.b16 %v692_v4  ;;  %v621_v57 = vshll.u32 %v2458_v43, 16  ;;  %v625_v23 = vshrl.u32 %v2458_v43, 16  ;;  %v614_v5 = vrot.slane %v612_v48, 4 }
  0x61   : > { %v2475_v54 = vpack.c.b16 %v939_v34, %v938_v61  ;;  %v2477_v24 = vpack.c.b16 %v997_v28, %v996_v47  ;;  %v631_v42 = vshll.u32 %v2467_v31, 16  ;;  %v617_v40 = vrot.slane %v615_v29, 5 }
  0x62   : > { %v1026_v49 = vpack.c.b16 %v995_v18, %v994_v17  ;;  %v623_v16 = vrot.slane %v621_v57, 5  ;;  %v627_v35 = vrot.slane %v625_v23, 4  ;;  %v1860_v36 = vrot.slane %v2115_v0, 9 }
  0x63   : > { %986 = vrot.lane.b32.xlu0 %v2475_v54, %s2059_s21  ;;  %1044 = vrot.lane.b32.xlu2 %v2477_v24, %s2060_s22  ;;  %v633_v25 = vrot.slane %v631_v42, 5  ;;  %v716_v47 = vrot.slane %v2118_v1, 5  ;;  %v719_v61 = vrot.slane %v2121_v2, 5  ;;  %v618_v55 = vor.u32 %v617_v40, %v614_v5 }
  0x64   : > { %v628_v34 = vor.u32 %v627_v35, %v623_v16  ;;  %v1859_v17 = vrot.slane %v2183_v63, 9  ;;  %v709_v28 = vrot.slane %v2193_v14, 5  ;;  %v712_v18 = vrot.slane %v2199_v19, 5 }
  0x65   : > { %v717_v4 = vsel %vm2437_vm5, %v1860_v36, %v716_v47  ;;  %v718_v48 = vrot.slane %v716_v47, 4  ;;  %v1858_v29 = vrot.slane %v2128_v7, 9  ;;  %v619_v0 = vrot.slane %v618_v55, 4 }
  0x66   : > { %1042 = vrot.lane.b32.xlu1 %v1026_v49, %s2060_s22  ;;  %v629_v1 = vrot.slane %v628_v34, 4  ;;  %v1002_v57 = vunpack.c.l.b16 %v717_v4  ;;  %v710_v2 = vsel %vm2437_vm5, %v1859_v17, %v709_v28  ;;  %v711_v14 = vrot.slane %v709_v28, 4 }
  0x67   : > { %v720_v63 = vsel %vm2437_vm5, %v718_v48, %v719_v61  ;;  %v1000_v23 = vunpack.c.l.b16 %v710_v2  ;;  %v702_v5 = vrot.slane %v2132_v9, 5  ;;  %v624_v19 = vsel %vm2150_vm2, %v619_v0, %v623_v16 }
  0x68   : > { %v634_v7 = vsel %vm2150_vm2, %v629_v1, %v633_v25  ;;  %v1003_v42 = vunpack.c.l.b16 %v720_v63  ;;  %v705_v49 = vrot.slane %v2135_v10, 5  ;;  %v944_v40 = vunpack.c.l.b16 %v624_v19 }
  0x69   : > { %v945_v35 = vunpack.c.l.b16 %v634_v7  ;;  %v713_v36 = vsel %vm2437_vm5, %v711_v14, %v712_v18  ;;  %v703_v47 = vsel %vm2437_vm5, %v1858_v29, %v702_v5  ;;  %v704_v55 = vrot.slane %v702_v5, 4 }
  0x6a   : > { %v2508_v61 = vpack.c.b16 %v1003_v42, %v1002_v57  ;;  %v1001_v9 = vunpack.c.l.b16 %v713_v36  ;;  %v998_v34 = vunpack.c.l.b16 %v703_v47  ;;  %v1863_v25 = vrot.slane %v2244_v21, 9 }
  0x6b   : > { %v2510_v16 = vpack.c.b16 %v945_v35, %v944_v40  ;;  %v737_v17 = vrot.slane %v2255_v37, 5  ;;  %v740_v10 = vrot.slane %v2263_v45, 5  ;;  %v706_v4 = vsel %vm2437_vm5, %v704_v55, %v705_v49 }
  0x6c   : > { %1050 = vrot.lane.b32.xlu2 %v2508_v61, %s2060_s22  ;;  %v2517_v28 = vpack.c.b16 %v1001_v9, %v1000_v23  ;;  %v1862_v48 = vrot.slane %v2270_v58, 9  ;;  %v730_v18 = vrot.slane %v2277_v22, 5  ;;  %v999_v21 = vunpack.c.l.b16 %v706_v4 }
  0x6d   : > { %992 = vrot.lane.b32.xlu0 %v2510_v16, %s2059_s21  ;;  %v738_v37 = vsel %vm2437_vm5, %v1863_v25, %v737_v17  ;;  %v739_v45 = vrot.slane %v737_v17, 4  ;;  %v733_v29 = vrot.slane %v2285_v30, 5  ;;  %v1861_v22 = vrot.slane %v2166_v44, 9 }
  0x6e   : > { %1048 = vrot.lane.b32.xlu1 %v2517_v28, %s2060_s22  ;;  %v1008_v0 = vunpack.c.l.b16 %v738_v37  ;;  %v731_v1 = vsel %vm2437_vm5, %v1862_v48, %v730_v18  ;;  %v732_v58 = vrot.slane %v730_v18, 4  ;;  %v2533_v57 = vpack.c.b16 %v999_v21, %v998_v34 }
  0x6f   : > { %v741_v2 = vsel %vm2437_vm5, %v739_v45, %v740_v10  ;;  %v1006_v63 = vunpack.c.l.b16 %v731_v1  ;;  %v723_v14 = vrot.slane %v2174_v56, 5  ;;  %v726_v5 = vrot.slane %v2180_v62, 5 }
  0x70   : > { %v1009_v23 = vunpack.c.l.b16 %v741_v2  ;;  %v734_v30 = vsel %vm2437_vm5, %v732_v58, %v733_v29  ;;  %v1866_v19 = vrot.slane %v2312_v13, 9  ;;  %v758_v49 = vrot.slane %v2325_v41, 5 }
  0x71   : > { %v1007_v7 = vunpack.c.l.b16 %v734_v30  ;;  %v724_v44 = vsel %vm2437_vm5, %v1861_v22, %v723_v14  ;;  %v725_v42 = vrot.slane %v723_v14, 4  ;;  %v761_v35 = vrot.slane %v2329_v51, 5 }
  0x72   : > { %v2545_v40 = vpack.c.b16 %v1009_v23, %v1008_v0  ;;  %v1865_v56 = vrot.slane %v2335_v3, 9  ;;  %v759_v13 = vsel %vm2437_vm5, %v1866_v19, %v758_v49  ;;  %v760_v47 = vrot.slane %v758_v49, 4 }
  0x73   : > { %v2549_v36 = vpack.c.b16 %v1007_v7, %v1006_v63  ;;  %v727_v62 = vsel %vm2437_vm5, %v725_v42, %v726_v5  ;;  %v1004_v9 = vunpack.c.l.b16 %v724_v44  ;;  %v1014_v41 = vunpack.c.l.b16 %v759_v13  ;;  %v3370_v7 = vld [vmem:[#allocation8_spill] sm:$0xff] }
  0x74   : > { %1056 = vrot.lane.b32.xlu2 %v2545_v40, %s2060_s22  ;;  %v751_v55 = vrot.slane %v2343_v38, 5  ;;  %v754_v51 = vrot.slane %v2351_v53, 5  ;;  %v1005_v3 = vunpack.c.l.b16 %v727_v62  ;;  %v762_v34 = vsel %vm2437_vm5, %v760_v47, %v761_v35 }
  0x75   : > { %1046 = vrot.lane.b32.xlu0 %v2533_v57, %s2060_s22  ;;  %v1864_v25 = vrot.slane %v2225_v52, 9  ;;  %v744_v17 = vrot.slane %v2235_v8, 5  ;;  %v1015_v10 = vunpack.c.l.b16 %v762_v34  ;;  %v747_v53 = vrot.slane %v2241_v20, 5  ;;  %v3372_v34 = vld [vmem:[#allocation13_spill] sm:$0xff] }
  0x76   : > { %1054 = vrot.lane.b32.xlu1 %v2549_v36, %s2060_s22  ;;  %v752_v38 = vsel %vm2437_vm5, %v1865_v56, %v751_v55  ;;  %v753_v4 = vrot.slane %v751_v55, 4  ;;  %v1869_v21 = vrot.slane %v2378_v6, 9  ;;  %v779_v45 = vrot.slane %v2389_v12, 5  ;;  %v3371_v55 = vld [vmem:[#allocation11_spill] sm:$0xff] }
  0x77   : > { %v1012_v48 = vunpack.c.l.b16 %v752_v38  ;;  %v746_v18 = vrot.slane %v744_v17, 4  ;;  %v2571_v37 = vpack.c.b16 %v1015_v10, %v1014_v41  ;;  %v745_v8 = vsel %vm2437_vm5, %v1864_v25, %v744_v17  ;;  %v3373_v10 = vld [vmem:[#allocation14_spill] sm:$0xff] }
  0x78   : > { %v755_v52 = vsel %vm2437_vm5, %v753_v4, %v754_v51  ;;  %v2578_v29 = vpack.c.b16 %v1005_v3, %v1004_v9  ;;  %v782_v1 = vrot.slane %v2397_v15, 5  ;;  %v1868_v20 = vrot.slane %v2401_v33, 9 }
  0x79   : > { %v1013_v0 = vunpack.c.l.b16 %v755_v52  ;;  %v748_v6 = vsel %vm2437_vm5, %v746_v18, %v747_v53  ;;  %v780_v58 = vsel %vm2437_vm5, %v1869_v21, %v779_v45  ;;  %v781_v22 = vrot.slane %v779_v45, 4 }
  0x7a   : > { %v772_v2 = vrot.slane %v2414_v59, 5  ;;  %v1010_v14 = vunpack.c.l.b16 %v745_v8  ;;  %v775_v12 = vrot.slane %v2417_v11, 5  ;;  %v1867_v23 = vrot.slane %v2289_v32, 9 }
  0x7b   : > { %v2587_v63 = vpack.c.b16 %v1013_v0, %v1012_v48  ;;  %v783_v15 = vsel %vm2437_vm5, %v781_v22, %v782_v1  ;;  %v1020_v33 = vunpack.c.l.b16 %v780_v58  ;;  %v1011_v59 = vunpack.c.l.b16 %v748_v6  ;;  %v1973_v1 = vld [vmem:[%s2112_s20 + $0xc] sm:$0xff]  ;;  %v971_v58 = vpop.permute.xlu2 %970 }
  0x7c   : > { %1062 = vrot.lane.b32.xlu2 %v2571_v37, %s2060_s22  ;;  %v773_v30 = vsel %vm2437_vm5, %v1868_v20, %v772_v2  ;;  %v774_v5 = vrot.slane %v772_v2, 4  ;;  %v1021_v19 = vunpack.c.l.b16 %v783_v15  ;;  %v765_v11 = vrot.slane %v2304_v60, 5  ;;  %v2648_v22 = vld [vmem:[%s2112_s20 + $0x30] sm:$0xff]  ;;  %v2651_v2 = vld [vmem:[%s2112_s20 + $0x24] sm:$0xff] }
  0x7d   : > { %1052 = vrot.lane.b32.xlu0 %v2578_v29, %s2060_s22  ;;  %v768_v32 = vrot.slane %v3370_v7, 5  ;;  %v1018_v42 = vunpack.c.l.b16 %v773_v30  ;;  %v1871_v49 = vrot.slane %v2451_v39, 9  ;;  %v793_v35 = vrot.slane %v2458_v43, 5  ;;  %v2668_v15 = vld [vmem:[%s2112_s20 + $0x48] sm:$0xff]  ;;  %v1982_v30 = vld [vmem:[%s2112_s20 + $0x78] sm:$0xff] }
  0x7e   : > { %1060 = vrot.lane.b32.xlu1 %v2587_v63, %s2060_s22  ;;  %v776_v44 = vsel %vm2437_vm5, %v774_v5, %v775_v12  ;;  %v766_v62 = vsel %vm2437_vm5, %v1867_v23, %v765_v11  ;;  %v767_v13 = vrot.slane %v765_v11, 4  ;;  %v796_v60 = vrot.slane %v2467_v31, 5  ;;  %v2662_v12 = vld [vmem:[%s2112_s20 + $0x54] sm:$0xff]  ;;  %v2680_v5 = vld [vmem:[%s2112_s20 + $0x3c] sm:$0xff] }
  0x7f   : > { %v1019_v56 = vunpack.c.l.b16 %v776_v44  ;;  %v2610_v47 = vpack.c.b16 %v1021_v19, %v1020_v33  ;;  %v1016_v9 = vunpack.c.l.b16 %v766_v62  ;;  %v795_v41 = vrot.slane %v793_v35, 4  ;;  %v2665_v23 = vld [vmem:[%s2112_s20 + $0x18] sm:$0xff]  ;;  %v2685_v19 = vld [vmem:[%s2112_s20 + $0x6c] sm:$0xff]  ;;  %v2713_v62 = vld [vmem:[%s2112_s20 + $0xc0] sm:$0xff] }
  0x80   : > { %v1870_v51 = vrot.slane %v3371_v55, 9  ;;  %v2613_v3 = vpack.c.b16 %v1011_v59, %v1010_v14  ;;  %v769_v39 = vsel %vm2437_vm5, %v767_v13, %v768_v32  ;;  %v786_v43 = vrot.slane %v3372_v34, 5  ;;  %v2695_v7 = vld [vmem:[%s2112_s20 + $0x9c] sm:$0xff]  ;;  %v2716_v13 = vld [vmem:[%s2112_s20 + $0x84] sm:$0xff] }
  0x81   : > { %v2618_v25 = vpack.c.b16 %v1019_v56, %v1018_v42  ;;  %v1017_v17 = vunpack.c.l.b16 %v769_v39  ;;  %v789_v38 = vrot.slane %v3373_v10, 5  ;;  %v794_v31 = vsel %vm2437_vm5, %v1871_v49, %v793_v35  ;;  %v2698_v32 = vld [vmem:[%s2112_s20 + $0x60] sm:$0xff]  ;;  %v2703_v42 = vld [vmem:[%s2112_s20 + $0x90] sm:$0xff] }
  0x82   : > { %v797_v4 = vsel %vm2437_vm5, %v795_v41, %v796_v60  ;;  %v787_v53 = vsel %vm2437_vm5, %v1870_v51, %v786_v43  ;;  %v788_v48 = vrot.slane %v786_v43, 4  ;;  %v1024_v8 = vunpack.c.l.b16 %v794_v31  ;;  %v2719_v60 = vld [vmem:[%s2112_s20 + $0xb4] sm:$0xff]  ;;  %v3375_v43 = vld [vmem:[#allocation3_spill] sm:$0xff] }
  0x83   : > { %v2629_v18 = vpack.c.b16 %v1017_v17, %v1016_v9  ;;  %v1022_v21 = vunpack.c.l.b16 %v787_v53  ;;  %v1025_v45 = vunpack.c.l.b16 %v797_v4  ;;  %v1986_v9 = vld [vmem:[%s2112_s20 + $0xa8] sm:$0xff]  ;;  %v3374_v39 = vld [vmem:[#allocation16_spill] sm:$0xff]  ;;  %v3376_v4 = vld [vmem:[#allocation6_spill] sm:$0xff]  ;;  %v1299_v53 = vsel %vm1284_vm6, %v2648_v22, %v971_v58 }
  0x84   : > { %1068 = vrot.lane.b32.xlu2 %v2610_v47, %s2060_s22  ;;  %v790_v52 = vsel %vm2437_vm5, %v788_v48, %v789_v38 }
  0x85   : > { %1058 = vrot.lane.b32.xlu0 %v2613_v3, %s2060_s22  ;;  %v1023_v0 = vunpack.c.l.b16 %v790_v52  ;;  %v2640_v6 = vpack.c.b16 %v1025_v45, %v1024_v8  ;;  %v3377_v8 = vld [vmem:[#allocation15_spill] sm:$0xff] }
  0x86   : > { %1066 = vrot.lane.b32.xlu1 %v2618_v25, %s2060_s22 }
  0x87   : > { %v2638_v20 = vpack.c.b16 %v1023_v0, %v1022_v21 }
  0x89   : > { %v2657_v14 = vpop.permute.xlu2 %972 }
  0x8c   : > { %1077 = vrot.lane.b32.xlu2 %v1973_v1, %s2061_s23 }
  0x8d   : > { %1064 = vrot.lane.b32.xlu0 %v2629_v18, %s2060_s22 }
  0x8e   : > { %1072 = vrot.lane.b32.xlu1 %v2640_v6, %s2060_s22 }
  0x94   : > { %1083 = vrot.lane.b32.xlu2 %v2648_v22, %s2061_s23 }
  0x95   : > { %1070 = vrot.lane.b32.xlu0 %v2638_v20, %s2060_s22 }
  0x96   : > { %1081 = vrot.lane.b32.xlu1 %v2651_v2, %s2061_s23 }
  0x97   : > { %v2676_v33 = vpop.permute.xlu2 %978  ;;  %v2687_v11 = vpop.permute.xlu1 %966 }
  0x9b   : > { %v2682_v59 = vpop.permute.xlu0 %962 }
  0x9c   : > { %1089 = vrot.lane.b32.xlu2 %v2662_v12, %s2061_s23 }
  0x9d   : > { %1079 = vrot.lane.b32.xlu0 %v2665_v23, %s2061_s23 }
  0x9e   : > { %1087 = vrot.lane.b32.xlu1 %v2668_v15, %s2061_s23 }
  0xa4   : > { %1095 = vrot.lane.b32.xlu2 %v1982_v30, %s2061_s23 }
  0xa5   : > { %1085 = vrot.lane.b32.xlu0 %v2680_v5, %s2061_s23  ;;  %v2700_v44 = vpop.permute.xlu2 %984  ;;  %v969_v56 = vpop.permute.xlu1 %968 }
  0xa6   : > { %1093 = vrot.lane.b32.xlu1 %v2685_v19, %s2061_s23 }
  0xab   : > { %v965_v49 = vpop.permute.xlu0 %964 }
  0xac   : > { %1101 = vrot.lane.b32.xlu2 %v2695_v7, %s2061_s23  ;;  %v1290_v35 = vsel %vm1284_vm6, %v1973_v1, %v965_v49  ;;  %v1972_v49 = vld [vmem:[%s2112_s20] sm:$0xff] }
  0xad   : > { %1091 = vrot.lane.b32.xlu0 %v2698_v32, %s2061_s23 }
  0xae   : > { %1099 = vrot.lane.b32.xlu1 %v2703_v42, %s2061_s23 }
  0xb3   : > { %v991_v41 = vpop.permute.xlu2 %990  ;;  %v977_v51 = vpop.permute.xlu1 %976 }
  0xb4   : > { %1107 = vrot.lane.b32.xlu2 %v2713_v62, %s2061_s23  ;;  %v2725_v55 = vsel %vm1284_vm6, %v1986_v9, %v991_v41  ;;  %v1308_v45 = vsel %vm1284_vm6, %v2662_v12, %v977_v51 }
  0xb5   : > { %1097 = vrot.lane.b32.xlu0 %v2716_v13, %s2061_s23 }
  0xb6   : > { %1105 = vrot.lane.b32.xlu1 %v2719_v60, %s2061_s23 }
  0xb9   : > { %v975_v10 = vpop.permute.xlu0 %974 }
  0xbc   : > { %1128 = vrot.lane.b32.xlu2 %v3374_v39, %s2062_s24 }
  0xbd   : > { %1103 = vrot.lane.b32.xlu0 %v1986_v9, %s2061_s23  ;;  %v1045_v34 = vpop.permute.xlu2 %1044 }
  0xbe   : > { %1114 = vrot.lane.b32.xlu1 %v3375_v43, %s2062_s24  ;;  %v2737_v17 = vsel %vm1333_vm7, %v1290_v35, %v1045_v34 }
  0xc1   : > { %v983_v38 = vpop.permute.xlu1 %982 }
  0xc2   : > { %v1317_v31 = vsel %vm1284_vm6, %v1982_v30, %v983_v38 }
  0xc4   : > { %1171 = vrot.lane.b32.xlu2 %v2610_v47, %s2063_s25 }
  0xc5   : > { %1112 = vrot.lane.b32.xlu0 %v3376_v4, %s2062_s24 }
  0xc6   : > { %1163 = vrot.lane.b32.xlu1 %v2587_v63, %s2063_s25  ;;  %v1051_v48 = vpop.permute.xlu2 %1050 }
  0xc7   : > { %v2749_v21 = vsel %vm1333_vm7, %v1299_v53, %v1051_v48  ;;  %v981_v52 = vpop.permute.xlu0 %980 }
  0xcc   : > { %1233 = vrot.lane.b32.xlu2 %v3377_v8, %s2064_s26 }
  0xcd   : > { %1136 = vrot.lane.b32.xlu0 %v2446_v27, %s2062_s24 }
  0xce   : > { %1206 = vrot.lane.b32.xlu1 %v1986_v9, %s2065_s27  ;;  %v1057_v0 = vpop.permute.xlu2 %1056  ;;  %v1287_v9 = vsel %vm1284_vm6, %v1972_v49, %v2682_v59  ;;  %v1296_v59 = vsel %vm1284_vm6, %v2651_v2, %v969_v56 }
  0xcf   : > { %v2759_v1 = vsel %vm1333_vm7, %v1308_v45, %v1057_v0  ;;  %v3378_v0 = vld [vmem:[#allocation4_spill] sm:$0xff] }
  0xd0   : > { %v989_v58 = vpop.permute.xlu1 %988 }
  0xd4   : > { %1276 = vrot.lane.b32.xlu2 %v2638_v20, %s2066_s28 }
  0xd5   : > { %1198 = vrot.lane.b32.xlu0 %v1982_v30, %s2065_s27  ;;  %v987_v35 = vpop.permute.xlu0 %986  ;;  %v1326_v30 = vsel %vm1284_vm6, %v2695_v7, %v989_v58  ;;  %v1293_v58 = vsel %vm1284_vm6, %v2665_v23, %v2687_v11 }
  0xd6   : > { %1268 = vrot.lane.b32.xlu1 %v2571_v37, %s2066_s28  ;;  %v1063_v41 = vpop.permute.xlu2 %1062 }
  0xd7   : > { %v2768_v51 = vsel %vm1333_vm7, %v1317_v31, %v1063_v41  ;;  %v1305_v41 = vsel %vm1284_vm6, %v2668_v15, %v975_v10 }
  0xd8   : > { %v1043_v34 = vpop.permute.xlu1 %1042 }
  0xd9   : > { %v1335_v38 = vsel %vm1333_vm7, %v1287_v9, %v1043_v34 }
  0xdc   : > { %1155 = vrot.lane.b32.xlu2 %v2578_v29, %s2063_s25 }
  0xdd   : > { %1241 = vrot.lane.b32.xlu0 %v2427_v46, %s2064_s26 }
  0xde   : > { %1147 = vrot.lane.b32.xlu1 %v2477_v24, %s2063_s25  ;;  %v1069_v31 = vpop.permute.xlu2 %1068 }
  0xdf   : > { %v993_v4 = vpop.permute.xlu0 %992  ;;  %v2782_v53 = vsel %vm1333_vm7, %v1326_v30, %v1069_v31  ;;  %v1314_v30 = vsel %vm1284_vm6, %v2685_v19, %v981_v52 }
  0xe0   : > { %v1049_v48 = vpop.permute.xlu1 %1048 }
  0xe1   : > { %v1341_v45 = vsel %vm1333_vm7, %v1296_v59, %v1049_v48  ;;  %v3379_v48 = vld [vmem:[#allocation10_spill] sm:$0xff] }
  0xe4   : > { %1217 = vrot.lane.b32.xlu2 %v3375_v43, %s2064_s26 }
  0xe5   : > { %1120 = vrot.lane.b32.xlu0 %v3378_v0, %s2062_s24 }
  0xe6   : > { %1190 = vrot.lane.b32.xlu1 %v2668_v15, %s2065_s27  ;;  %v1078_v24 = vpop.permute.xlu2 %1077 }
  0xe7   : > { %v1047_v49 = vpop.permute.xlu0 %1046  ;;  %v2797_v56 = vsel %vm1366_vm8, %v1335_v38, %v1078_v24  ;;  %v1302_v38 = vsel %vm1284_vm6, %v2680_v5, %v2657_v14 }
  0xe8   : > { %v1339_v43 = vsel %vm1333_vm7, %v1293_v58, %v1047_v49  ;;  %v1055_v9 = vpop.permute.xlu1 %1054  ;;  %v1323_v58 = vsel %vm1284_vm6, %v2703_v42, %v987_v35 }
  0xe9   : > { %v1347_v34 = vsel %vm1333_vm7, %v1305_v41, %v1055_v9 }
  0xec   : > { %1260 = vrot.lane.b32.xlu2 %v2549_v36, %s2066_s28 }
  0xed   : > { %1182 = vrot.lane.b32.xlu0 %v2665_v23, %s2065_s27 }
  0xee   : > { %1252 = vrot.lane.b32.xlu1 %v2533_v57, %s2066_s28  ;;  %v1084_v11 = vpop.permute.xlu2 %1083 }
  0xef   : > { %v1053_v15 = vpop.permute.xlu0 %1052  ;;  %v2813_v10 = vsel %vm1366_vm8, %v1341_v45, %v1084_v11  ;;  %v1311_v45 = vsel %vm1284_vm6, %v2698_v32, %v2676_v33  ;;  %v1320_v33 = vsel %vm1284_vm6, %v2716_v13, %v2700_v44 }
  0xf0   : > { %v1345_v31 = vsel %vm1333_vm7, %v1302_v38, %v1053_v15  ;;  %v1061_v59 = vpop.permute.xlu1 %1060 }
  0xf1   : > { %v1353_v23 = vsel %vm1333_vm7, %v1314_v30, %v1061_v59 }
  0xf4   : > { %1165 = vrot.lane.b32.xlu2 %v2571_v37, %s2063_s25 }
  0xf5   : > { %1225 = vrot.lane.b32.xlu0 %v3379_v48, %s2064_s26 }
  0xf6   : > { %1138 = vrot.lane.b32.xlu1 %v2427_v46, %s2062_s24  ;;  %v1090_v14 = vpop.permute.xlu2 %1089 }
  0xf7   : > { %v1059_v52 = vpop.permute.xlu0 %1058  ;;  %v2829_v24 = vsel %vm1366_vm8, %v1347_v34, %v1090_v14  ;;  %v1332_v34 = vsel %vm1284_vm6, %v2719_v60, %v993_v4 }
  0xf8   : > { %v2834_v37 = vsel %vm1333_vm7, %v1311_v45, %v1059_v52  ;;  %v1067_v49 = vpop.permute.xlu1 %1066  ;;  %v2896_v45 = vld [vmem:[%s2112_s20 + $0xc4] sm:$0xf] }
  0xf9   : > { %v2837_v41 = vsel %vm1333_vm7, %v1323_v58, %v1067_v49  ;;  %v808_v49 = vshll.u32 %v2896_v45, 16 }
  0xfc   : > { %1208 = vrot.lane.b32.xlu2 %v2719_v60, %s2065_s27 }
  0xfd   : > { %1130 = vrot.lane.b32.xlu0 %v3377_v8, %s2062_s24 }
  0xfe   : > { %1200 = vrot.lane.b32.xlu1 %v2716_v13, %s2065_s27  ;;  %v1096_v46 = vpop.permute.xlu2 %1095 }
  0xff   : > { %v1065_v35 = vpop.permute.xlu0 %1064  ;;  %v2849_v9 = vsel %vm1366_vm8, %v1353_v23, %v1096_v46 }
 0x100   : > { %v1357_v11 = vsel %vm1333_vm7, %v1320_v33, %v1065_v35  ;;  %v1073_v38 = vpop.permute.xlu1 %1072 }
 0x101   : > { %v1365_v8 = vsel %vm1333_vm7, %v1332_v34, %v1073_v38  ;;  %v3381_v34 = vld [vmem:[#allocation9_spill] sm:$0xff] }
 0x104   : > { %1270 = vrot.lane.b32.xlu2 %v2629_v18, %s2066_s28 }
 0x105   : > { %1173 = vrot.lane.b32.xlu0 %v2638_v20, %s2063_s25  ;;  %v3380_v20 = vld [vmem:[#allocation12_spill] sm:$0xff] }
 0x106   : > { %1243 = vrot.lane.b32.xlu1 %v2510_v16, %s2064_s26  ;;  %v2861_v44 = vpop.permute.xlu2 %1101 }
 0x107   : > { %v1071_v13 = vpop.permute.xlu0 %1070 }
 0x108   : > { %v1363_v60 = vsel %vm1333_vm7, %v2725_v55, %v1071_v13  ;;  %v1082_v4 = vpop.permute.xlu1 %1081 }
 0x109   : > { %v2866_v15 = vsel %vm1366_vm8, %v1339_v43, %v1082_v4 }
 0x10c   : > { %1149 = vrot.lane.b32.xlu2 %v2533_v57, %s2063_s25  ;;  %v2889_v57 = vld [vmem:[%s2112_s20 + $0xc0] sm:$0xf] }
 0x10d   : > { %1235 = vrot.lane.b32.xlu0 %v3380_v20, %s2064_s26  ;;  %v802_v58 = vshll.u32 %v2889_v57, 16 }
 0x10e   : > { %1122 = vrot.lane.b32.xlu1 %v3379_v48, %s2062_s24  ;;  %v1108_v30 = vpop.permute.xlu2 %1107 }
 0x10f   : > { %v1080_v59 = vpop.permute.xlu0 %1079  ;;  %v2875_v23 = vsel %vm1366_vm8, %v1365_v8, %v1108_v30  ;;  %v804_v33 = vrot.slane %v802_v58, 5  ;;  %v244_v8 = vld [vmem:[%s2112_s20 + $0xc8] sm:$0x1] }
 0x110   : > { %v2879_v55 = vsel %vm1366_vm8, %v2737_v17, %v1080_v59  ;;  %v1088_v43 = vpop.permute.xlu1 %1087 }
 0x111   : > { %v2882_v14 = vsel %vm1366_vm8, %v1345_v31, %v1088_v43  ;;  %v1568_v43 = vld [vmem:[%s3323_s1 + $0x10] sm:$0x3] }
 0x112   : > { %v1582_v58 = vunpack.c.l.b16 %v1568_v43 }
 0x114   : > { %1192 = vrot.lane.b32.xlu2 %v2662_v12, %s2065_s27  ;;  %v799_v12 = vshrl.u32 %v2889_v57, 16 }
 0x115   : > { %1278 = vrot.lane.b32.xlu0 %v2640_v6, %s2066_s28 }
 0x116   : > { %1184 = vrot.lane.b32.xlu1 %v2651_v2, %s2065_s27  ;;  %v2893_v48 = vpop.permute.xlu2 %1128  ;;  %v812_v2 = vshrl.u32 %v2896_v45, 16  ;;  %v801_v46 = vrot.slane %v799_v12, 4  ;;  %v818_v12 = vshll.u32 %v244_v8, 16 }
 0x117   : > { %v1086_v17 = vpop.permute.xlu0 %1085 }
 0x118   : > { %v2900_v31 = vsel %vm1366_vm8, %v2749_v21, %v1086_v17  ;;  %v2902_v52 = vpop.permute.xlu1 %1093  ;;  %v810_v21 = vrot.slane %v808_v49, 5  ;;  %v814_v35 = vrot.slane %v812_v2, 4  ;;  %v805_v59 = vor.u32 %v804_v33, %v801_v46 }
 0x119   : > { %v1585_v49 = vpack.c.b16 %v1582_v58, %v1582_v58  ;;  %v820_v33 = vrot.slane %v818_v12, 5  ;;  %v827_v12 = vrot.slane %v2896_v45, 5 }
 0x11a   : > { %v815_v17 = vor.u32 %v814_v35, %v810_v21  ;;  %v806_v2 = vrot.slane %v805_v59, 4  ;;  %v1991_v59 = vld [vmem:[%s3323_s1 + $0x8] sm:$0xff] }
 0x11c   : > { %1254 = vrot.lane.b32.xlu2 %v2517_v28, %s2066_s28  ;;  %v816_v46 = vrot.slane %v815_v17, 4 }
 0x11d   : > { %1157 = vrot.lane.b32.xlu0 %v2549_v36, %s2063_s25 }
 0x11e   : > { %1227 = vrot.lane.b32.xlu1 %v3381_v34, %s2064_s26  ;;  %v2914_v38 = vpop.permute.xlu2 %1171  ;;  %v821_v17 = vsel %vm2150_vm2, %v816_v46, %v820_v33 }
 0x11f   : > { %v1092_v13 = vpop.permute.xlu0 %1091  ;;  %v1110_v58 = vunpack.c.l.b16 %v821_v17 }
 0x120   : > { %v2919_v4 = vsel %vm1366_vm8, %v2759_v1, %v1092_v13  ;;  %v1100_v30 = vpop.permute.xlu1 %1099  ;;  %v3382_v1 = vld [vmem:[#allocation5_spill] sm:$0xff]  ;;  %v1623_v13 = vsel %vm1621_vm9, %v1585_v49, 0  ;;  %v1872_v49 = vrot.slane %v2889_v57, 9 }
 0x121   : > { %v2925_v36 = vsel %vm1366_vm8, %v1357_v11, %v1100_v30  ;;  %1993 = vmatpush.bf16.msra.mxu2 %v1623_v13  ;;  %1994 = vmatpush.bf16.msra.mxu3 %v1623_v13 }
 0x122   : > { %1630 = vmatpush.bf16.msra.mxu0 %v1623_v13  ;;  %1992 = vmatpush.bf16.msra.mxu1 %v1623_v13  ;;  %v828_v57 = vsel %vm2437_vm5, %v1872_v49, %v827_v12  ;;  %v3383_v49 = vld [vmem:[#allocation2_spill] sm:$0xff] }
 0x124   : > { %1140 = vrot.lane.b32.xlu2 %v2510_v16, %s2062_s24 }
 0x125   : > { %1219 = vrot.lane.b32.xlu0 %v3382_v1, %s2064_s26  ;;  %1996 = vmatpush.bf16.msra.mxu2 %v1991_v59 }
 0x126   : > { %1132 = vrot.lane.b32.xlu1 %v3380_v20, %s2062_s24  ;;  %v2933_v11 = vpop.permute.xlu2 %1233  ;;  %v811_v20 = vsel %vm2150_vm2, %v806_v2, %v810_v21  ;;  %1997 = vmatpush.bf16.msra.mxu3 %v1991_v59  ;;  %v830_v2 = vrot.slane %v244_v8, 5 }
 0x127   : > { %v1098_v35 = vpop.permute.xlu0 %1097  ;;  %1631 = vmatpush.bf16.msra.mxu0 %v1991_v59  ;;  %1995 = vmatpush.bf16.msra.mxu1 %v1991_v59 }
 0x128   : > { %v2937_v16 = vsel %vm1366_vm8, %v2768_v51, %v1098_v35  ;;  %v1106_v30 = vpop.permute.xlu1 %1105  ;;  %v1109_v51 = vunpack.c.l.b16 %v811_v20  ;;  %v1144_v35 = vunpack.c.l.b16 %v828_v57  ;;  %v3032_v57 = vld [vmem:[%s2112_s20 + $0xcc] sm:$0xf] }
 0x129   : > { %v2943_v43 = vsel %vm1366_vm8, %v1363_v60, %v1106_v30  ;;  %v1990_v60 = vld [vmem:[%s3323_s1] sm:$0xff] }
 0x12a   : > { %1999 = vmatpush.bf16.msra.mxu2 %v1990_v60  ;;  %2000 = vmatpush.bf16.msra.mxu3 %v1990_v60  ;;  %v2966_v13 = vpack.c.b16 %v1110_v58, %v1109_v51  ;;  %v1384_v51 = vsel %vm1366_vm8, %v2834_v37, %v2902_v52 }
 0x12b   : > { %1632 = vmatpush.bf16.msra.mxu0 %v1990_v60  ;;  %1998 = vmatpush.bf16.msra.mxu1 %v1990_v60 }
 0x12c   : > { %1202 = vrot.lane.b32.xlu2 %v2703_v42, %s2065_s27  ;;  %v829_v42 = vrot.slane %v827_v12, 4 }
 0x12d   : > { %1262 = vrot.lane.b32.xlu0 %v2545_v40, %s2066_s28 }
 0x12e   : > { %1175 = vrot.lane.b32.xlu1 %v2640_v6, %s2063_s25  ;;  %v2959_v21 = vpop.permute.xlu2 %1276  ;;  %v831_v8 = vsel %vm2437_vm5, %v829_v42, %v830_v2 }
 0x12f   : > { %v1104_v45 = vpop.permute.xlu0 %1103 }
 0x130   : > { %v2964_v46 = vsel %vm1366_vm8, %v2782_v53, %v1104_v45  ;;  %v1115_v33 = vpop.permute.xlu1 %1114 }
 0x131   : > { %v2970_v6 = vsel %vm1399_vm10, %v2879_v55, %v1115_v33  ;;  %v1145_v55 = vunpack.c.l.b16 %v831_v8  ;;  %v3035_v8 = vld [vmem:[%s2112_s20 + $0xd0] sm:$0xf] }
 0x133   : > { %v2986_v20 = vpack.c.b16 %v1145_v55, %v1144_v35  ;;  %v842_v35 = vshll.u32 %v3035_v8, 16  ;;  %v846_v55 = vshrl.u32 %v3035_v8, 16 }
 0x134   : > { %1245 = vrot.lane.b32.xlu2 %v2966_v13, %s2064_s26 }
 0x135   : > { %1167 = vrot.lane.b32.xlu0 %v2629_v18, %s2063_s25 }
 0x136   : > { %1237 = vrot.lane.b32.xlu1 %v2475_v54, %s2064_s26  ;;  %v2982_v53 = vpop.permute.xlu2 %1155 }
 0x137   : > { %v2984_v30 = vpop.permute.xlu0 %1112 }
 0x138   : > { %v1164_v59 = vpop.permute.xlu1 %1163 }
 0x13c   : > { %1116 = vrot.lane.b32.xlu2 %v3382_v1, %s2062_s24 }
 0x13d   : > { %1210 = vrot.lane.b32.xlu0 %v2713_v62, %s2065_s27  ;;  %v1417_v62 = vsel %vm1399_vm10, %v1384_v51, %v2893_v48  ;;  %v844_v51 = vrot.slane %v842_v35, 5 }
 0x13e   : > { %1280 = vrot.lane.b32.xlu1 %v2986_v20, %s2066_s28  ;;  %v2994_v18 = vpop.permute.xlu2 %1217  ;;  %v1450_v58 = vsel %vm1432_vm11, %v1417_v62, %v1164_v59  ;;  %v848_v62 = vrot.slane %v846_v55, 4 }
 0x13f   : > { %v1137_v17 = vpop.permute.xlu0 %1136 }
 0x140   : > { %v1207_v12 = vpop.permute.xlu1 %1206 }
 0x144   : > { %1159 = vrot.lane.b32.xlu2 %v2545_v40, %s2063_s25 }
 0x145   : > { %1272 = vrot.lane.b32.xlu0 %v2618_v25, %s2066_s28 }
 0x146   : > { %1151 = vrot.lane.b32.xlu1 %v2517_v28, %s2063_s25  ;;  %v3007_v1 = vpop.permute.xlu2 %1260  ;;  %v1392_v28 = vsel %vm1366_vm8, %v2837_v41, %v2861_v44 }
 0x147   : > { %v1199_v37 = vpop.permute.xlu0 %1198  ;;  %v1425_v45 = vsel %vm1399_vm10, %v1392_v28, %v1137_v17  ;;  %v1401_v28 = vsel %vm1399_vm10, %v2797_v56, %v2984_v30 }
 0x148   : > { %v1483_v52 = vsel %vm1465_vm12, %v1450_v58, %v1199_v37  ;;  %v1269_v40 = vpop.permute.xlu1 %1268  ;;  %v1458_v42 = vsel %vm1432_vm11, %v1425_v45, %v2914_v38  ;;  %v836_v38 = vshll.u32 %v3032_v57, 16  ;;  %v247_v37 = vld [vmem:[%s2112_s20 + $0xd4] sm:$0x1] }
 0x149   : > { %v1516_v60 = vsel %vm1498_vm13, %v1483_v52, %v2933_v11  ;;  %v1491_v41 = vsel %vm1465_vm12, %v1458_v42, %v1207_v12 }
 0x14a   : > { %v1549_v48 = vsel %vm1531_vm14, %v1516_v60, %v1269_v40  ;;  %v838_v12 = vrot.slane %v836_v38, 5  ;;  %v849_v40 = vor.u32 %v848_v62, %v844_v51  ;;  %v852_v60 = vshll.u32 %v247_v37, 16 }
 0x14b   : > { %1962 = vmatmul.msk.bf16.vlgmr.msra.gmra.mxu2 %vm1588_vm15, %v1549_v48 }
 0x14c   : > { %1221 = vrot.lane.b32.xlu2 %v3383_v49, %s2064_s26 }
 0x14d   : > { %1124 = vrot.lane.b32.xlu0 %v3381_v34, %s2062_s24 }
 0x14e   : > { %1194 = vrot.lane.b32.xlu1 %v2698_v32, %s2065_s27  ;;  %v3027_v11 = vpop.permute.xlu2 %1165  ;;  %v833_v32 = vshrl.u32 %v3032_v57, 16 }
 0x14f   : > { %v1242_v44 = vpop.permute.xlu0 %1241 }
 0x150   : > { %v1524_v2 = vsel %vm1498_vm13, %v1491_v41, %v1242_v44  ;;  %v1148_v33 = vpop.permute.xlu1 %1147  ;;  %v835_v17 = vrot.slane %v833_v32, 4  ;;  %v850_v41 = vrot.slane %v849_v40, 4  ;;  %v854_v44 = vrot.slane %v852_v60, 5  ;;  %v1989_v32 = vld [vmem:[%s2112_s20 + $0xcc] sm:$0xff] }
 0x151   : > { %v1557_v34 = vsel %vm1531_vm14, %v1524_v2, %v2959_v21  ;;  %v1434_v48 = vsel %vm1432_vm11, %v1401_v28, %v1148_v33 }
 0x152   : > { %1966 = vmatmul.msk.bf16.vlgmr.msra.gmra.mxu3 %vm1588_vm15, %v1557_v34  ;;  %v839_v52 = vor.u32 %v838_v12, %v835_v17  ;;  %v855_v30 = vsel %vm2150_vm2, %v850_v41, %v854_v44 }
 0x153   : > { %v1215_v33 = vunpack.c.l.b16 %v855_v30 }
 0x154   : > { %1264 = vrot.lane.b32.xlu2 %v2613_v3, %s2066_s28  ;;  %v840_v42 = vrot.slane %v839_v52, 4 }
 0x155   : > { %1186 = vrot.lane.b32.xlu0 %v2648_v22, %s2065_s27  ;;  %v3384_v22 = vld [vmem:[#allocation7_spill] sm:$0xff] }
 0x156   : > { %1256 = vrot.lane.b32.xlu1 %v2508_v61, %s2066_s28  ;;  %v3050_v21 = vpop.permute.xlu2 %1208 }
 0x157   : > { %v1121_v59 = vpop.permute.xlu0 %1120 }
 0x158   : > { %v1191_v58 = vpop.permute.xlu1 %1190  ;;  %v1409_v56 = vsel %vm1399_vm10, %v2900_v31, %v1121_v59 }
 0x15c   : > { %1169 = vrot.lane.b32.xlu2 %v2618_v25, %s2063_s25 }
 0x15d   : > { %1229 = vrot.lane.b32.xlu0 %v3384_v22, %s2064_s26 }
 0x15e   : > { %1142 = vrot.lane.b32.xlu1 %v2966_v13, %s2062_s24  ;;  %v1271_v34 = vpop.permute.xlu2 %1270  ;;  %v845_v13 = vsel %vm2150_vm2, %v840_v42, %v844_v51 }
 0x15f   : > { %v1183_v45 = vpop.permute.xlu0 %1182  ;;  %v1214_v31 = vunpack.c.l.b16 %v845_v13 }
 0x160   : > { %v1467_v2 = vsel %vm1465_vm12, %v1434_v48, %v1183_v45  ;;  %v1253_v25 = vpop.permute.xlu1 %1252 }
 0x161   : > { %v1500_v38 = vsel %vm1498_vm13, %v1467_v2, %v2994_v18  ;;  %v1442_v18 = vsel %vm1432_vm11, %v1409_v56, %v2982_v53  ;;  %v1216_v51 = vpack.c.b16 %v1215_v33, %v1214_v31  ;;  %v861_v53 = vrot.slane %v3035_v8, 5 }
 0x162   : > { %v1533_v35 = vsel %vm1531_vm14, %v1500_v38, %v1253_v25  ;;  %v1475_v55 = vsel %vm1465_vm12, %v1442_v18, %v1191_v58  ;;  %v864_v58 = vrot.slane %v247_v37, 5 }
 0x163   : > { %1954 = vmatmul.msk.bf16.vlgmr.msra.gmra.mxu0 %vm1588_vm15, %v1533_v35  ;;  %v863_v62 = vrot.slane %v861_v53, 4 }
 0x164   : > { %1212 = vrot.lane.b32.xlu2 %v1989_v32, %s2065_s27 }
 0x165   : > { %1134 = vrot.lane.b32.xlu0 %v2475_v54, %s2062_s24  ;;  %v865_v8 = vsel %vm2437_vm5, %v863_v62, %v864_v58 }
 0x166   : > { %1204 = vrot.lane.b32.xlu1 %v2695_v7, %s2065_s27  ;;  %v1150_v54 = vpop.permute.xlu2 %1149  ;;  %v1873_v7 = vrot.slane %v3032_v57, 9 }
 0x167   : > { %v1226_v59 = vpop.permute.xlu0 %1225 }
 0x168   : > { %v1508_v17 = vsel %vm1498_vm13, %v1475_v55, %v1226_v59  ;;  %v1139_v26 = vpop.permute.xlu1 %1138  ;;  %v862_v40 = vsel %vm2437_vm5, %v1873_v7, %v861_v53 }
 0x169   : > { %v1541_v12 = vsel %vm1531_vm14, %v1508_v17, %v3007_v1 }
 0x16a   : > { %1958 = vmatmul.msk.bf16.vlgmr.msra.gmra.mxu1 %vm1588_vm15, %v1541_v12 }
 0x16c   : > { %1274 = vrot.lane.b32.xlu2 %v2610_v47, %s2066_s28  ;;  %v1249_v47 = vunpack.c.l.b16 %v862_v40 }
 0x16d   : > { %1177 = vrot.lane.b32.xlu0 %v2986_v20, %s2063_s25  ;;  %v1250_v20 = vunpack.c.l.b16 %v865_v8 }
 0x16e   : > { %1247 = vrot.lane.b32.xlu1 %v1216_v51, %s2064_s26  ;;  %v1193_v60 = vpop.permute.xlu2 %1192 }
 0x16f   : > { %v1131_v52 = vpop.permute.xlu0 %1130  ;;  %v1251_v28 = vpack.c.b16 %v1250_v20, %v1249_v47 }
 0x170   : > { %v1201_v1 = vpop.permute.xlu1 %1200  ;;  %v1419_v48 = vsel %vm1399_vm10, %v2849_v9, %v1131_v52 }
 0x171   : > { %v1452_v50 = vsel %vm1432_vm11, %v1419_v48, %v3027_v11 }
 0x174   : > { %1126 = vrot.lane.b32.xlu2 %v3384_v22, %s2062_s24 }
 0x175   : > { %1239 = vrot.lane.b32.xlu0 %v2446_v27, %s2064_s26 }
 0x176   : > { %1118 = vrot.lane.b32.xlu1 %v3383_v49, %s2062_s24  ;;  %v1255_v27 = vpop.permute.xlu2 %1254  ;;  %v1485_v49 = vsel %vm1465_vm12, %v1452_v50, %v1201_v1 }
 0x177   : > { %v1174_v57 = vpop.permute.xlu0 %1173 }
 0x178   : > { %v1244_v37 = vpop.permute.xlu1 %1243 }
 0x17c   : > { %1188 = vrot.lane.b32.xlu2 %v2680_v5, %s2065_s27  ;;  %v1427_v5 = vsel %vm1399_vm10, %v2964_v46, %v1139_v26 }
 0x17d   : > { %1282 = vrot.lane.b32.xlu0 %v1251_v28, %s2066_s28  ;;  %v1460_v41 = vsel %vm1432_vm11, %v1427_v5, %v1174_v57 }
 0x17e   : > { %1161 = vrot.lane.b32.xlu1 %v2613_v3, %s2063_s25  ;;  %v1493_v3 = vsel %vm1465_vm12, %v1460_v41, %v3050_v21  ;;  %v1141_v46 = vpop.permute.xlu2 %1140 }
 0x17f   : > { %v1236_v22 = vpop.permute.xlu0 %1235  ;;  %v1526_v11 = vsel %vm1498_vm13, %v1493_v3, %v1244_v37 }
 0x180   : > { %v1518_v45 = vsel %vm1498_vm13, %v1485_v49, %v1236_v22  ;;  %v1123_v42 = vpop.permute.xlu1 %1122 }
 0x181   : > { %v1551_v9 = vsel %vm1531_vm14, %v1518_v45, %v1271_v34 }
 0x182   : > { %1963 = vmatmul.msk.bf16.gmra.mxu2 %vm1588_vm15, %v1551_v9 }
 0x184   : > { %1231 = vrot.lane.b32.xlu2 %v3374_v39, %s2064_s26 }
 0x185   : > { %1153 = vrot.lane.b32.xlu0 %v2508_v61, %s2063_s25 }
 0x186   : > { %1223 = vrot.lane.b32.xlu1 %v3378_v0, %s2064_s26  ;;  %v1203_v21 = vpop.permute.xlu2 %1202  ;;  %v1436_v0 = vsel %vm1432_vm11, %v2970_v6, %v1150_v54 }
 0x187   : > { %v1279_v44 = vpop.permute.xlu0 %1278 }
 0x188   : > { %v1559_v2 = vsel %vm1531_vm14, %v1526_v11, %v1279_v44  ;;  %v1185_v34 = vpop.permute.xlu1 %1184 }
 0x189   : > { %1967 = vmatmul.msk.bf16.gmra.mxu3 %vm1588_vm15, %v1559_v2  ;;  %v1469_v25 = vsel %vm1465_vm12, %v1436_v0, %v1185_v34 }
 0x18d   : > { %1196 = vrot.lane.b32.xlu0 %v2685_v19, %s2065_s27 }
 0x18e   : > { %1266 = vrot.lane.b32.xlu1 %v2587_v63, %s2066_s28  ;;  %v1411_v63 = vsel %vm1399_vm10, %v2882_v14, %v1123_v42  ;;  %v1246_v13 = vpop.permute.xlu2 %1245  ;;  %v1429_v14 = vsel %vm1399_vm10, %v2943_v43, %v1141_v46 }
 0x18f   : > { %v1158_v61 = vpop.permute.xlu0 %1157 }
 0x190   : > { %v1228_v39 = vpop.permute.xlu1 %1227  ;;  %v1444_v56 = vsel %vm1432_vm11, %v1411_v63, %v1158_v61 }
 0x195   : > { %1258 = vrot.lane.b32.xlu0 %v2578_v29, %s2066_s28  ;;  %v1477_v29 = vsel %vm1465_vm12, %v1444_v56, %v1193_v60 }
 0x196   : > { %v1510_v6 = vsel %vm1498_vm13, %v1477_v29, %v1228_v39  ;;  %v1117_v33 = vpop.permute.xlu2 %1116 }
 0x197   : > { %v1220_v32 = vpop.permute.xlu0 %1219  ;;  %v1405_v57 = vsel %vm1399_vm10, %v2866_v15, %v1117_v33  ;;  %v3177_v15 = vld [vmem:[%s3324_s2] ss:$0 sm:$0xff] }
 0x198   : > { %v1502_v38 = vsel %vm1498_vm13, %v1469_v25, %v1220_v32  ;;  %v1133_v35 = vpop.permute.xlu1 %1132 }
 0x199   : > { %v1535_v19 = vsel %vm1531_vm14, %v1502_v38, %v1255_v27  ;;  %v1421_v7 = vsel %vm1399_vm10, %v2937_v16, %v1133_v35 }
 0x19a   : > { %1955 = vmatmul.msk.bf16.gmra.mxu0 %vm1588_vm15, %v1535_v19 }
 0x19e   : > { %v1160_v12 = vpop.permute.xlu2 %1159 }
 0x19f   : > { %v1263_v30 = vpop.permute.xlu0 %1262 }
 0x1a0   : > { %v1543_v18 = vsel %vm1531_vm14, %v1510_v6, %v1263_v30  ;;  %v1176_v31 = vpop.permute.xlu1 %1175 }
 0x1a1   : > { %1959 = vmatmul.msk.bf16.gmra.mxu1 %vm1588_vm15, %v1543_v18  ;;  %v1462_v17 = vsel %vm1432_vm11, %v1429_v14, %v1176_v31 }
 0x1a6   : > { %v1222_v60 = vpop.permute.xlu2 %1221 }
 0x1a7   : > { %v1168_v55 = vpop.permute.xlu0 %1167 }
 0x1a8   : > { %v1238_v59 = vpop.permute.xlu1 %1237  ;;  %v1454_v58 = vsel %vm1432_vm11, %v1421_v7, %v1168_v55 }
 0x1a9   : > { %v1487_v43 = vsel %vm1465_vm12, %v1454_v58, %v1203_v21 }
 0x1aa   : > { %v1520_v52 = vsel %vm1498_vm13, %v1487_v43, %v1238_v59 }
 0x1ae   : > { %v1265_v16 = vpop.permute.xlu2 %1264 }
 0x1af   : > { %v1211_v26 = vpop.permute.xlu0 %1210 }
 0x1b0   : > { %v1495_v54 = vsel %vm1465_vm12, %v1462_v17, %v1211_v26  ;;  %v1281_v51 = vpop.permute.xlu1 %1280 }
 0x1b1   : > { %v1528_v53 = vsel %vm1498_vm13, %v1495_v54, %v1246_v13 }
 0x1b2   : > { %v1561_v62 = vsel %vm1531_vm14, %v1528_v53, %v1281_v51 }
 0x1b3   : > { %1968 = vmatmul.msk.bf16.gmra.mxu3 %vm1588_vm15, %v1561_v62 }
 0x1b6   : > { %v1170_v45 = vpop.permute.xlu2 %1169 }
 0x1b7   : > { %v1273_v1 = vpop.permute.xlu0 %1272 }
 0x1b8   : > { %v1553_v40 = vsel %vm1531_vm14, %v1520_v52, %v1273_v1  ;;  %v1152_v8 = vpop.permute.xlu1 %1151 }
 0x1b9   : > { %1964 = vmatmul.msk.bf16.gmra.mxu2 %vm1588_vm15, %v1553_v40  ;;  %v1438_v37 = vsel %vm1432_vm11, %v1405_v57, %v1152_v8 }
 0x1be   : > { %v1213_v0 = vpop.permute.xlu2 %1212 }
 0x1bf   : > { %v1125_v47 = vpop.permute.xlu0 %1124 }
 0x1c0   : > { %v1195_v20 = vpop.permute.xlu1 %1194  ;;  %v1413_v22 = vsel %vm1399_vm10, %v2829_v24, %v1125_v47 }
 0x1c1   : > { %v1446_v42 = vsel %vm1432_vm11, %v1413_v22, %v1160_v12 }
 0x1c2   : > { %v1479_v5 = vsel %vm1465_vm12, %v1446_v42, %v1195_v20 }
 0x1c6   : > { %v1275_v30 = vpop.permute.xlu2 %1274 }
 0x1c7   : > { %v1187_v28 = vpop.permute.xlu0 %1186 }
 0x1c8   : > { %v1471_v48 = vsel %vm1465_vm12, %v1438_v37, %v1187_v28  ;;  %v1257_v50 = vpop.permute.xlu1 %1256 }
 0x1c9   : > { %v1504_v27 = vsel %vm1498_vm13, %v1471_v48, %v1222_v60 }
 0x1ca   : > { %v1537_v49 = vsel %vm1531_vm14, %v1504_v27, %v1257_v50 }
 0x1cb   : > { %1956 = vmatmul.msk.bf16.gmra.mxu0 %vm1588_vm15, %v1537_v49 }
 0x1ce   : > { %v1674_v9 = vpop.f32.mrf.mxu2  ;;  %v1127_v43 = vpop.permute.xlu2 %1126 }
 0x1cf   : > { %v1230_v41 = vpop.permute.xlu0 %1229  ;;  %v1675_v3 = vadd.f32 %v3177_v15, %v1674_v9  ;;  %v1415_v28 = vsel %vm1399_vm10, %v2919_v4, %v1127_v43 }
 0x1d0   : > { %v1512_v11 = vsel %vm1498_vm13, %v1479_v5, %v1230_v41  ;;  %v1143_v24 = vpop.permute.xlu1 %1142 }
 0x1d1   : > { %v1545_v44 = vsel %vm1531_vm14, %v1512_v11, %v1265_v16  ;;  %v1730_v46 = vmax.f32 %v1675_v3, 0.0  ;;  %v1431_v53 = vsel %vm1399_vm10, %v2875_v23, %v1143_v24 }
 0x1d2   : > { %1960 = vmatmul.msk.bf16.gmra.mxu1 %vm1588_vm15, %v1545_v44 }
 0x1d3   : > { %1762 = vst.msk [vmem:[%s3186_s17 + $0x80] sm:$0xff] %vm1531_vm14, %v1730_v46 }
 0x1d5   : > { %v1694_v2 = vpop.f32.mrf.mxu3 }
 0x1d6   : > { %v1695_v34 = vadd.f32 %v3177_v15, %v1694_v2  ;;  %v1676_v61 = vpop.f32.mrf.mxu2  ;;  %v1189_v16 = vpop.permute.xlu2 %1188 }
 0x1d7   : > { %v1135_v39 = vpop.permute.xlu0 %1134  ;;  %v1677_v21 = vadd.f32 %v3177_v15, %v1676_v61 }
 0x1d8   : > { %v1738_v25 = vmax.f32 %v1695_v34, 0.0  ;;  %v1205_v32 = vpop.permute.xlu1 %1204  ;;  %v1423_v18 = vsel %vm1399_vm10, %v2925_v36, %v1135_v39 }
 0x1d9   : > { %v1731_v38 = vmax.f32 %v1677_v21, 0.0  ;;  %v1456_v33 = vsel %vm1432_vm11, %v1423_v18, %v1170_v45 }
 0x1da   : > { %1770 = vst.msk [vmem:[%s3186_s17 + $0xc0] sm:$0xff] %vm1531_vm14, %v1738_v25  ;;  %v1489_v55 = vsel %vm1465_vm12, %v1456_v33, %v1205_v32 }
 0x1db   : > { %1763 = vst.msk [vmem:[%s3186_s17 + $0x88] sm:$0xff] %vm1531_vm14, %v1731_v38 }
 0x1dd   : > { %v1696_v35 = vpop.f32.mrf.mxu3 }
 0x1de   : > { %v1697_v19 = vadd.f32 %v3177_v15, %v1696_v35  ;;  %v1232_v48 = vpop.permute.xlu2 %1231 }
 0x1df   : > { %v1178_v63 = vpop.permute.xlu0 %1177 }
 0x1e0   : > { %v1739_v56 = vmax.f32 %v1697_v19, 0.0  ;;  %v1634_v13 = vpop.f32.mrf.mxu0  ;;  %v1248_v29 = vpop.permute.xlu1 %1247  ;;  %v1464_v62 = vsel %vm1432_vm11, %v1431_v53, %v1178_v63 }
 0x1e1   : > { %v1635_v6 = vadd.f32 %v3177_v15, %v1634_v13  ;;  %v1497_v52 = vsel %vm1465_vm12, %v1464_v62, %v1213_v0 }
 0x1e2   : > { %1771 = vst.msk [vmem:[%s3186_s17 + $0xc8] sm:$0xff] %vm1531_vm14, %v1739_v56  ;;  %v1530_v1 = vsel %vm1498_vm13, %v1497_v52, %v1248_v29 }
 0x1e3   : > { %v1714_v31 = vmax.f32 %v1635_v6, 0.0 }
 0x1e5   : > { %1746 = vst.msk [vmem:[%s3186_s17] sm:$0xff] %vm1531_vm14, %v1714_v31 }
 0x1e7   : > { %v1654_v59 = vpop.f32.mrf.mxu1  ;;  %v1240_v14 = vpop.permute.xlu0 %1239 }
 0x1e8   : > { %v1655_v17 = vadd.f32 %v3177_v15, %v1654_v59  ;;  %v1522_v26 = vsel %vm1498_vm13, %v1489_v55, %v1240_v14  ;;  %v1636_v12 = vpop.f32.mrf.mxu0  ;;  %v1119_v54 = vpop.permute.xlu1 %1118 }
 0x1e9   : > { %v1555_v51 = vsel %vm1531_vm14, %v1522_v26, %v1275_v30  ;;  %v1637_v36 = vadd.f32 %v3177_v15, %v1636_v12  ;;  %v1407_v42 = vsel %vm1399_vm10, %v2813_v10, %v1119_v54 }
 0x1ea   : > { %v1722_v7 = vmax.f32 %v1655_v17, 0.0  ;;  %1965 = vmatmul.msk.bf16.gmra.mxu2 %vm1588_vm15, %v1555_v51 }
 0x1eb   : > { %v1715_v58 = vmax.f32 %v1637_v36, 0.0 }
 0x1ec   : > { %1754 = vst.msk [vmem:[%s3186_s17 + $0x40] sm:$0xff] %vm1531_vm14, %v1722_v7 }
 0x1ed   : > { %1747 = vst.msk [vmem:[%s3186_s17 + $0x8] sm:$0xff] %vm1531_vm14, %v1715_v58 }
 0x1ef   : > { %v1656_v40 = vpop.f32.mrf.mxu1  ;;  %v1283_v8 = vpop.permute.xlu0 %1282 }
 0x1f0   : > { %v1657_v23 = vadd.f32 %v3177_v15, %v1656_v40  ;;  %v1563_v60 = vsel %vm1531_vm14, %v1530_v1, %v1283_v8  ;;  %v1162_v47 = vpop.permute.xlu1 %1161 }
 0x1f1   : > { %1969 = vmatmul.msk.bf16.gmra.mxu3 %vm1588_vm15, %v1563_v60  ;;  %v1448_v50 = vsel %vm1432_vm11, %v1415_v28, %v1162_v47 }
 0x1f2   : > { %v1723_v20 = vmax.f32 %v1657_v23, 0.0 }
 0x1f4   : > { %1755 = vst.msk [vmem:[%s3186_s17 + $0x48] sm:$0xff] %vm1531_vm14, %v1723_v20 }
 0x1f7   : > { %v1154_v57 = vpop.permute.xlu0 %1153 }
 0x1f8   : > { %v1224_v37 = vpop.permute.xlu1 %1223  ;;  %v1440_v5 = vsel %vm1432_vm11, %v1407_v42, %v1154_v57 }
 0x1f9   : > { %v1473_v41 = vsel %vm1465_vm12, %v1440_v5, %v1189_v16 }
 0x1fa   : > { %v1506_v11 = vsel %vm1498_vm13, %v1473_v41, %v1224_v37 }
 0x1ff   : > { %v1197_v27 = vpop.permute.xlu0 %1196 }
 0x200   : > { %v1481_v49 = vsel %vm1465_vm12, %v1448_v50, %v1197_v27  ;;  %v1267_v22 = vpop.permute.xlu1 %1266 }
 0x201   : > { %v1514_v45 = vsel %vm1498_vm13, %v1481_v49, %v1232_v48 }
 0x202   : > { %v1547_v9 = vsel %vm1531_vm14, %v1514_v45, %v1267_v22 }
 0x203   : > { %1961 = vmatmul.msk.bf16.gmra.mxu1 %vm1588_vm15, %v1547_v9 }
 0x205   : > { %v1679_v4 = vpop.f32.mrf.mxu2 }
 0x206   : > { %v1680_v3 = vadd.f32 %v3177_v15, %v1679_v4 }
 0x207   : > { %v1259_v24 = vpop.permute.xlu0 %1258 }
 0x208   : > { %v1732_v44 = vmax.f32 %v1680_v3, 0.0  ;;  %v1539_v46 = vsel %vm1531_vm14, %v1506_v11, %v1259_v24 }
 0x209   : > { %1957 = vmatmul.msk.bf16.gmra.mxu0 %vm1588_vm15, %v1539_v46 }
 0x20a   : > { %1764 = vst.msk [vmem:[%s3186_s17 + $0x90] sm:$0xff] %vm1531_vm14, %v1732_v44 }
 0x20c   : > { %v1699_v10 = vpop.f32.mrf.mxu3 }
 0x20d   : > { %v1700_v2 = vadd.f32 %v3177_v15, %v1699_v10  ;;  %v1681_v34 = vpop.f32.mrf.mxu2 }
 0x20e   : > { %v1682_v61 = vadd.f32 %v3177_v15, %v1681_v34 }
 0x20f   : > { %v1740_v39 = vmax.f32 %v1700_v2, 0.0 }
 0x210   : > { %v1733_v21 = vmax.f32 %v1682_v61, 0.0 }
 0x211   : > { %1772 = vst.msk [vmem:[%s3186_s17 + $0xd0] sm:$0xff] %vm1531_vm14, %v1740_v39 }
 0x212   : > { %1765 = vst.msk [vmem:[%s3186_s17 + $0x98] sm:$0xff] %vm1531_vm14, %v1733_v21 }
 0x214   : > { %v1701_v0 = vpop.f32.mrf.mxu3 }
 0x215   : > { %v1702_v25 = vadd.f32 %v3177_v15, %v1701_v0 }
 0x217   : > { %v1741_v32 = vmax.f32 %v1702_v25, 0.0  ;;  %v1639_v38 = vpop.f32.mrf.mxu0 }
 0x218   : > { %v1640_v35 = vadd.f32 %v3177_v15, %v1639_v38 }
 0x219   : > { %1773 = vst.msk [vmem:[%s3186_s17 + $0xd8] sm:$0xff] %vm1531_vm14, %v1741_v32 }
 0x21a   : > { %v1716_v19 = vmax.f32 %v1640_v35, 0.0 }
 0x21c   : > { %1748 = vst.msk [vmem:[%s3186_s17 + $0x10] sm:$0xff] %vm1531_vm14, %v1716_v19 }
 0x21e   : > { %v1659_v63 = vpop.f32.mrf.mxu1 }
 0x21f   : > { %v1660_v56 = vadd.f32 %v3177_v15, %v1659_v63  ;;  %v1641_v13 = vpop.f32.mrf.mxu0 }
 0x220   : > { %v1642_v29 = vadd.f32 %v3177_v15, %v1641_v13 }
 0x221   : > { %v1724_v6 = vmax.f32 %v1660_v56, 0.0 }
 0x222   : > { %v1717_v30 = vmax.f32 %v1642_v29, 0.0 }
 0x223   : > { %1756 = vst.msk [vmem:[%s3186_s17 + $0x50] sm:$0xff] %vm1531_vm14, %v1724_v6 }
 0x224   : > { %1749 = vst.msk [vmem:[%s3186_s17 + $0x18] sm:$0xff] %vm1531_vm14, %v1717_v30 }
 0x226   : > { %v1661_v18 = vpop.f32.mrf.mxu1 }
 0x227   : > { %v1662_v31 = vadd.f32 %v3177_v15, %v1661_v18 }
 0x229   : > { %v1725_v33 = vmax.f32 %v1662_v31, 0.0 }
 0x22b   : > { %1757 = vst.msk [vmem:[%s3186_s17 + $0x58] sm:$0xff] %vm1531_vm14, %v1725_v33 }
 0x236   : > { %v1704_v55 = vpop.f32.mrf.mxu3 }
 0x237   : > { %v1705_v59 = vadd.f32 %v3177_v15, %v1704_v55 }
 0x239   : > { %v1742_v14 = vmax.f32 %v1705_v59, 0.0 }
 0x23b   : > { %1774 = vst.msk [vmem:[%s3186_s17 + $0xe0] sm:$0xff] %vm1531_vm14, %v1742_v14 }
 0x23c   : > { %v1684_v17 = vpop.f32.mrf.mxu2 }
 0x23d   : > { %v1685_v26 = vadd.f32 %v3177_v15, %v1684_v17 }
 0x23e   : > { %v1706_v12 = vpop.f32.mrf.mxu3 }
 0x23f   : > { %v1734_v54 = vmax.f32 %v1685_v26, 0.0  ;;  %v1707_v51 = vadd.f32 %v3177_v15, %v1706_v12 }
 0x241   : > { %1766 = vst.msk [vmem:[%s3186_s17 + $0xa0] sm:$0xff] %vm1531_vm14, %v1734_v54  ;;  %v1743_v36 = vmax.f32 %v1707_v51, 0.0 }
 0x243   : > { %1775 = vst.msk [vmem:[%s3186_s17 + $0xe8] sm:$0xff] %vm1531_vm14, %v1743_v36 }
 0x244   : > { %v1686_v53 = vpop.f32.mrf.mxu2 }
 0x245   : > { %v1687_v7 = vadd.f32 %v3177_v15, %v1686_v53 }
 0x247   : > { %v1735_v62 = vmax.f32 %v1687_v7, 0.0 }
 0x248   : > { %v1644_v58 = vpop.f32.mrf.mxu0 }
 0x249   : > { %1767 = vst.msk [vmem:[%s3186_s17 + $0xa8] sm:$0xff] %vm1531_vm14, %v1735_v62  ;;  %v1645_v43 = vadd.f32 %v3177_v15, %v1644_v58 }
 0x24b   : > { %v1718_v52 = vmax.f32 %v1645_v43, 0.0 }
 0x24d   : > { %1750 = vst.msk [vmem:[%s3186_s17 + $0x20] sm:$0xff] %vm1531_vm14, %v1718_v52 }
 0x24f   : > { %v1664_v1 = vpop.f32.mrf.mxu1 }
 0x250   : > { %v1665_v40 = vadd.f32 %v3177_v15, %v1664_v1  ;;  %v1646_v8 = vpop.f32.mrf.mxu0 }
 0x251   : > { %v1647_v23 = vadd.f32 %v3177_v15, %v1646_v8 }
 0x252   : > { %v1726_v60 = vmax.f32 %v1665_v40, 0.0 }
 0x253   : > { %v1719_v47 = vmax.f32 %v1647_v23, 0.0 }
 0x254   : > { %1758 = vst.msk [vmem:[%s3186_s17 + $0x60] sm:$0xff] %vm1531_vm14, %v1726_v60 }
 0x255   : > { %1751 = vst.msk [vmem:[%s3186_s17 + $0x28] sm:$0xff] %vm1531_vm14, %v1719_v47 }
 0x257   : > { %v1666_v20 = vpop.f32.mrf.mxu1 }
 0x258   : > { %v1667_v16 = vadd.f32 %v3177_v15, %v1666_v20 }
 0x25a   : > { %v1727_v57 = vmax.f32 %v1667_v16, 0.0 }
 0x25c   : > { %1759 = vst.msk [vmem:[%s3186_s17 + $0x68] sm:$0xff] %vm1531_vm14, %v1727_v57 }
 0x26d   : > { %v1689_v37 = vpop.f32.mrf.mxu2 }
 0x26e   : > { %v1690_v28 = vadd.f32 %v3177_v15, %v1689_v37 }
 0x270   : > { %v1736_v48 = vmax.f32 %v1690_v28, 0.0 }
 0x272   : > { %1768 = vst.msk [vmem:[%s3186_s17 + $0xb0] sm:$0xff] %vm1531_vm14, %v1736_v48 }
 0x274   : > { %v1709_v50 = vpop.f32.mrf.mxu3 }
 0x275   : > { %v1710_v27 = vadd.f32 %v3177_v15, %v1709_v50  ;;  %v1691_v49 = vpop.f32.mrf.mxu2 }
 0x276   : > { %v1692_v22 = vadd.f32 %v3177_v15, %v1691_v49 }
 0x277   : > { %v1744_v45 = vmax.f32 %v1710_v27, 0.0 }
 0x278   : > { %v1737_v42 = vmax.f32 %v1692_v22, 0.0 }
 0x279   : > { %1776 = vst.msk [vmem:[%s3186_s17 + $0xf0] sm:$0xff] %vm1531_vm14, %v1744_v45 }
 0x27a   : > { %1769 = vst.msk [vmem:[%s3186_s17 + $0xb8] sm:$0xff] %vm1531_vm14, %v1737_v42 }
 0x27c   : > { %v1711_v9 = vpop.f32.mrf.mxu3 }
 0x27d   : > { %v1712_v5 = vadd.f32 %v3177_v15, %v1711_v9 }
 0x27f   : > { %v1745_v4 = vmax.f32 %v1712_v5, 0.0 }
 0x280   : > { %v1669_v41 = vpop.f32.mrf.mxu1 }
 0x281   : > { %1777 = vst.msk [vmem:[%s3186_s17 + $0xf8] sm:$0xff] %vm1531_vm14, %v1745_v4  ;;  %v1670_v3 = vadd.f32 %v3177_v15, %v1669_v41 }
 0x283   : > { %v1728_v11 = vmax.f32 %v1670_v3, 0.0 }
 0x285   : > { %1760 = vst.msk [vmem:[%s3186_s17 + $0x70] sm:$0xff] %vm1531_vm14, %v1728_v11 }
 0x286   : > { %v1649_v24 = vpop.f32.mrf.mxu0 }
 0x287   : > { %v1650_v44 = vadd.f32 %v3177_v15, %v1649_v24 }
 0x288   : > { %v1671_v46 = vpop.f32.mrf.mxu1 }
 0x289   : > { %v1720_v10 = vmax.f32 %v1650_v44, 0.0  ;;  %v1672_v2 = vadd.f32 %v3177_v15, %v1671_v46 }
 0x28b   : > { %1752 = vst.msk [vmem:[%s3186_s17 + $0x30] sm:$0xff] %vm1531_vm14, %v1720_v10  ;;  %v1729_v34 = vmax.f32 %v1672_v2, 0.0 }
 0x28d   : > { %1761 = vst.msk [vmem:[%s3186_s17 + $0x78] sm:$0xff] %vm1531_vm14, %v1729_v34 }
 0x28e   : > { %v1651_v61 = vpop.f32.mrf.mxu0 }
 0x28f   : > { %v1652_v39 = vadd.f32 %v3177_v15, %v1651_v61 }
 0x291   : > { %v1721_v21 = vmax.f32 %v1652_v39, 0.0 }
 0x293   : > { %1753 = vst.msk [vmem:[%s3186_s17 + $0x38] sm:$0xff] %vm1531_vm14, %v1721_v21 }
 0x294 PF: > { %s13_s14 = sadd.s32 1, %s2057_s14   ;;  %s3385_s12 = smov %s2053_s13 }
 0x295   : > { %p10_p6 = scmp.ge.s32.totalorder %s13_s14, 4   ;;  %s3386_s13 = smov %s3388_s15 }
 0x297   :  { %12 = sbr.rel (!%p10_p6) target bundleno = 2 (0x2), region = 63 }

</bundles_post_ra>
